<compile_context>
chip_gen: v7x
topology: tpu7x:2x2x1
jax: 0.10.0
libtpu: 0.0.40
codegen_flags: <defaults>
</compile_context>

<pallas_src>
import functools

import jax
import jax.numpy as jnp
from jax.experimental import pallas as pl
from jax.experimental.pallas import tpu as pltpu


def _round_up(a, m):
    return (a + m - 1) // m * m


def _leaky_relu(v, slope=0.1):
    return jnp.where(v >= 0, v, slope * v)


def vae_kernel(
    x_ref, eps_ref,
    w1, w2, w3, w4, w5, w6, b_ref,
    recon_ref, mlv_ref,
    *, bias_offsets, bias_widths, z_dim,
):
    """Encoder -> reparameterize -> decoder for one batch tile.

    Weights are bf16 (full arrays, resident across the batch grid); activations
    are bf16 going into each MXU matmul, accumulation stays f32.
    """
    def lin(h, w_r, idx):
        off = bias_offsets[idx]
        width = bias_widths[idx]
        b = b_ref[:, off:off + width]                      # static, lane-aligned slice
        return jnp.dot(h.astype(jnp.bfloat16), w_r[...],
                       preferred_element_type=jnp.float32) + b

    x = x_ref[...]                                          # already bf16

    # --- encoder ---
    h1 = _leaky_relu(lin(x, w1, 0), 0.1)
    h2 = _leaky_relu(lin(h1, w2, 1), 0.1)
    mlv = lin(h2, w3, 2)                                    # (TM, 128): [mu | log_var | 0-pad]
    mu = mlv[:, :z_dim]
    log_var = mlv[:, z_dim:2 * z_dim]

    # --- sampling (reparameterization): z = eps * exp(0.5*log_var) + mu ---
    std = jnp.exp(0.5 * log_var)
    z = eps_ref[...] * std + mu

    # --- decoder ---
    h = _leaky_relu(lin(z, w4, 3), 0.1)
    h = _leaky_relu(lin(h, w5, 4), 0.1)
    recon = jax.nn.sigmoid(lin(h, w6, 5))

    recon_ref[...] = recon
    mlv_ref[...] = mlv


def init_vae_params(key, x_dim, h_dim1, h_dim2, z_dim):
    """Deterministic PyTorch-style (uniform +/- 1/sqrt(fan_in)) init."""
    dims = [
        ("fc1", x_dim, h_dim1),
        ("fc2", h_dim1, h_dim2),
        ("fc31", h_dim2, z_dim),
        ("fc32", h_dim2, z_dim),
        ("fc4", z_dim, h_dim2),
        ("fc5", h_dim2, h_dim1),
        ("fc6", h_dim1, x_dim),
    ]
    params = {}
    keys = jax.random.split(key, 2 * len(dims))
    for i, (name, fan_in, fan_out) in enumerate(dims):
        bound = 1.0 / (fan_in ** 0.5)
        w = jax.random.uniform(
            keys[2 * i], (fan_in, fan_out), jnp.float32, -bound, bound)
        b = jax.random.uniform(
            keys[2 * i + 1], (1, fan_out), jnp.float32, -bound, bound)
        params[name] = (w, b)
    return params


@functools.partial(jax.jit, static_argnames=("x_dim", "h_dim1", "h_dim2", "z_dim"))
def vae_forward(x, eps, params, *, x_dim, h_dim1, h_dim2, z_dim):
    batch = x.shape[0]
    # mirrors x.view(-1, 784); bf16 here is bit-identical to casting in-kernel
    # right before the MXU and halves the dominant input DMA.
    x2 = x.reshape(batch, -1).astype(jnp.bfloat16)

    # --- batch padding: only up to the sublane multiple (8) ---
    padded = _round_up(batch, 8)
    if padded != batch:
        x2 = jnp.pad(x2, ((0, padded - batch), (0, 0)))
        eps_p = jnp.pad(eps.astype(jnp.float32), ((0, padded - batch), (0, 0)))
    else:
        eps_p = eps.astype(jnp.float32)

    # --- row tile: cap 512; ensure >= 2 grid steps when possible (v7x megacore) ---
    cap = 512
    if padded >= 16:
        tm = min(cap, _round_up(padded // 2, 8))
    else:
        tm = padded
    n_blocks = -(-padded // tm)                             # cdiv; last block may be ragged

    # --- weights: fuse fc31/fc32, pad to 128 output lanes, cast to bf16 ---
    w1, b1 = params["fc1"]
    w2, b2 = params["fc2"]
    w31, b31 = params["fc31"]
    w32, b32 = params["fc32"]
    w4, b4 = params["fc4"]
    w5, b5 = params["fc5"]
    w6, b6 = params["fc6"]

    w3 = jnp.concatenate([w31, w32], axis=1)                # (h2, 2*z)
    b3 = jnp.concatenate([b31, b32], axis=1)                # (1, 2*z)
    mlv_w = _round_up(2 * z_dim, 128)                       # lane-dense mu|log_var width
    if mlv_w != 2 * z_dim:
        w3 = jnp.pad(w3, ((0, 0), (0, mlv_w - 2 * z_dim)))
        b3 = jnp.pad(b3, ((0, 0), (0, mlv_w - 2 * z_dim)))

    weights_f32 = [w1, w2, w3, w4, w5, w6]
    weights = [w.astype(jnp.bfloat16) for w in weights_f32]
    biases = [b1, b2, b3, b4, b5, b6]

    # --- pack biases into one lane-aligned (1, B_TOTAL) f32 array ---
    bias_widths = tuple(int(b.shape[1]) for b in biases)
    bias_offsets = []
    segs = []
    off = 0
    for b in biases:
        bias_offsets.append(off)
        w_pad = _round_up(b.shape[1], 128) - b.shape[1]
        segs.append(jnp.pad(b, ((0, 0), (0, w_pad))) if w_pad else b)
        off += _round_up(b.shape[1], 128)
    bias_offsets = tuple(bias_offsets)
    b_total = off
    b_packed = jnp.concatenate(segs, axis=1).astype(jnp.float32)   # (1, b_total)

    kernel = functools.partial(
        vae_kernel,
        bias_offsets=bias_offsets,
        bias_widths=bias_widths,
        z_dim=z_dim,
    )

    grid = (n_blocks,)
    row_spec = lambda n: pl.BlockSpec((tm, n), lambda i: (i, 0))
    const_spec = lambda shape: pl.BlockSpec(shape, lambda i: (0, 0))

    in_specs = [
        row_spec(x_dim),                                    # x tile (bf16)
        row_spec(z_dim),                                    # eps tile
    ] + [const_spec(w.shape) for w in weights] + [
        const_spec((1, b_total)),                           # packed biases
    ]
    out_specs = (
        row_spec(x_dim),                                    # reconstruction
        row_spec(mlv_w),                                    # [mu | log_var | 0-pad]
    )
    out_shapes = (
        jax.ShapeDtypeStruct((padded, x_dim), jnp.float32),
        jax.ShapeDtypeStruct((padded, mlv_w), jnp.float32),
    )

    flops = 2 * padded * (
        x_dim * h_dim1 + h_dim1 * h_dim2 + h_dim2 * mlv_w
        + z_dim * h_dim2 + h_dim2 * h_dim1 + h_dim1 * x_dim)
    transcendentals = padded * (z_dim + x_dim)              # exp(std) + sigmoid
    bytes_accessed = (
        sum(int(w.size) for w in weights_f32) * 2           # bf16 weights
        + b_total * 4                                       # biases
        + padded * x_dim * 2                                # x in (bf16)
        + padded * x_dim * 4                                # recon out (f32)
        + padded * z_dim * 4                                # eps
        + padded * mlv_w * 4)                               # mu|log_var out
    cost = pl.CostEstimate(
        flops=int(flops),
        transcendentals=int(transcendentals),
        bytes_accessed=int(bytes_accessed),
    )

    recon_p, mlv_p = pl.pallas_call(
        kernel,
        out_shape=out_shapes,
        grid=grid,
        in_specs=in_specs,
        out_specs=out_specs,
        compiler_params=pltpu.CompilerParams(
            dimension_semantics=("parallel",),
            vmem_limit_bytes=32 * 1024 * 1024),
        cost_estimate=cost,
    )(x2, eps_p, *weights, b_packed)

    recon = recon_p[:batch]
    mu = mlv_p[:batch, :z_dim]
    log_var = mlv_p[:batch, z_dim:2 * z_dim]
    return recon, mu, log_var


if __name__ == "__main__":
    # Module's forward hardcodes view(-1, 784) -> MNIST-like input (B, 1, 28, 28).
    X_DIM, H1, H2, Z = 784, 256, 128, 32
    BATCH = 2

    root = jax.random.PRNGKey(0)
    k_x, k_eps, k_params = jax.random.split(root, 3)

    x = jax.random.uniform(k_x, (BATCH, 1, 28, 28), jnp.float32)      # NCHW
    eps = jax.random.normal(k_eps, (BATCH, Z), jnp.float32)           # randn_like(std)
    params = init_vae_params(k_params, X_DIM, H1, H2, Z)

    recon, mu, log_var = vae_forward(
        x, eps, params, x_dim=X_DIM, h_dim1=H1, h_dim2=H2, z_dim=Z)
    jax.block_until_ready((recon, mu, log_var))

    assert recon.shape == (BATCH, X_DIM)
    assert mu.shape == (BATCH, Z) and log_var.shape == (BATCH, Z)
    assert bool(jnp.all(jnp.isfinite(recon)))
    assert bool(jnp.all(jnp.isfinite(mu))) and bool(jnp.all(jnp.isfinite(log_var)))
    assert bool(jnp.all((recon >= 0.0) & (recon <= 1.0)))             # sigmoid range

    print("KERNEL_OK")
</pallas_src>

<mosaic_0001>
module attributes {stable_mosaic.version = 11 : i64} {
  func.func @vae_kernel(%arg0: i32, %arg1: memref<8x784xbf16, #tpu.memory_space<vmem>>, %arg2: memref<8x32xf32, #tpu.memory_space<vmem>>, %arg3: memref<784x256xbf16, #tpu.memory_space<vmem>>, %arg4: memref<256x128xbf16, #tpu.memory_space<vmem>>, %arg5: memref<128x128xbf16, #tpu.memory_space<vmem>>, %arg6: memref<32x128xbf16, #tpu.memory_space<vmem>>, %arg7: memref<128x256xbf16, #tpu.memory_space<vmem>>, %arg8: memref<256x784xbf16, #tpu.memory_space<vmem>>, %arg9: memref<1x1792xf32, #tpu.memory_space<vmem>>, %arg10: memref<8x784xf32, #tpu.memory_space<vmem>>, %arg11: memref<8x128xf32, #tpu.memory_space<vmem>>) attributes {dimension_semantics = [#tpu.dimension_semantics<parallel>], iteration_bounds = array<i64: 1>, scalar_prefetch = 0 : i64, scratch_operands = 0 : i64, tpu.core_type = #tpu.core_type<tc>, window_params = [{transform_indices = @transform_0, window_bounds = array<i64: 8, 784>}, {transform_indices = @transform_1, window_bounds = array<i64: 8, 32>}, {pipeline_mode = #tpu.pipeline_mode<synchronous>, transform_indices = @transform_2, window_bounds = array<i64: 784, 256>}, {pipeline_mode = #tpu.pipeline_mode<synchronous>, transform_indices = @transform_3, window_bounds = array<i64: 256, 128>}, {pipeline_mode = #tpu.pipeline_mode<synchronous>, transform_indices = @transform_4, window_bounds = array<i64: 128, 128>}, {pipeline_mode = #tpu.pipeline_mode<synchronous>, transform_indices = @transform_5, window_bounds = array<i64: 32, 128>}, {pipeline_mode = #tpu.pipeline_mode<synchronous>, transform_indices = @transform_6, window_bounds = array<i64: 128, 256>}, {pipeline_mode = #tpu.pipeline_mode<synchronous>, transform_indices = @transform_7, window_bounds = array<i64: 256, 784>}, {pipeline_mode = #tpu.pipeline_mode<synchronous>, transform_indices = @transform_8, window_bounds = array<i64: 1, 1792>}, {transform_indices = @transform_9, window_bounds = array<i64: 8, 784>}, {transform_indices = @transform_10, window_bounds = array<i64: 8, 128>}]} {
    %c0 = arith.constant 0 : index
    %c0_0 = arith.constant 0 : index
    %0 = vector.load %arg1[%c0, %c0_0] : memref<8x784xbf16, #tpu.memory_space<vmem>>, vector<8x784xbf16>
    %c0_1 = arith.constant 0 : index
    %c0_2 = arith.constant 0 : index
    %1 = vector.load %arg9[%c0_1, %c0_2] : memref<1x1792xf32, #tpu.memory_space<vmem>>, vector<1x256xf32>
    %c0_3 = arith.constant 0 : index
    %c0_4 = arith.constant 0 : index
    %2 = vector.load %arg3[%c0_3, %c0_4] : memref<784x256xbf16, #tpu.memory_space<vmem>>, vector<784x256xbf16>
    %cst = arith.constant dense<0.000000e+00> : vector<8x256xf32>
    %3 = tpu.matmul %0, %2, %cst {dimension_numbers = #tpu.dot_dimension_numbers<[1], [0], [0], [1], [0, 0, 1, 1], [], []>} : vector<8x784xbf16>, vector<784x256xbf16>, vector<8x256xf32> -> vector<8x256xf32>
    %4 = vector.broadcast %1 : vector<1x256xf32> to vector<8x256xf32>
    %5 = arith.addf %3, %4 : vector<8x256xf32>
    %cst_5 = arith.constant 0.000000e+00 : f32
    %6 = vector.broadcast %cst_5 : f32 to vector<8x256xf32>
    %7 = arith.cmpf oge, %5, %6 : vector<8x256xf32>
    %cst_6 = arith.constant 1.000000e-01 : f32
    %8 = vector.broadcast %cst_6 : f32 to vector<8x256xf32>
    %9 = arith.mulf %8, %5 : vector<8x256xf32>
    %10 = arith.select %7, %5, %9 : vector<8x256xi1>, vector<8x256xf32>
    %c0_7 = arith.constant 0 : index
    %c256 = arith.constant 256 : index
    %11 = vector.load %arg9[%c0_7, %c256] : memref<1x1792xf32, #tpu.memory_space<vmem>>, vector<1x128xf32>
    %12 = arith.truncf %10 : vector<8x256xf32> to vector<8x256xbf16>
    %c0_8 = arith.constant 0 : index
    %c0_9 = arith.constant 0 : index
    %13 = vector.load %arg4[%c0_8, %c0_9] : memref<256x128xbf16, #tpu.memory_space<vmem>>, vector<256x128xbf16>
    %cst_10 = arith.constant dense<0.000000e+00> : vector<8x128xf32>
    %14 = tpu.matmul %12, %13, %cst_10 {dimension_numbers = #tpu.dot_dimension_numbers<[1], [0], [0], [1], [0, 0, 1, 1], [], []>} : vector<8x256xbf16>, vector<256x128xbf16>, vector<8x128xf32> -> vector<8x128xf32>
    %15 = vector.broadcast %11 : vector<1x128xf32> to vector<8x128xf32>
    %16 = arith.addf %14, %15 : vector<8x128xf32>
    %cst_11 = arith.constant 0.000000e+00 : f32
    %17 = vector.broadcast %cst_11 : f32 to vector<8x128xf32>
    %18 = arith.cmpf oge, %16, %17 : vector<8x128xf32>
    %cst_12 = arith.constant 1.000000e-01 : f32
    %19 = vector.broadcast %cst_12 : f32 to vector<8x128xf32>
    %20 = arith.mulf %19, %16 : vector<8x128xf32>
    %21 = arith.select %18, %16, %20 : vector<8x128xi1>, vector<8x128xf32>
    %c0_13 = arith.constant 0 : index
    %c384 = arith.constant 384 : index
    %22 = vector.load %arg9[%c0_13, %c384] : memref<1x1792xf32, #tpu.memory_space<vmem>>, vector<1x128xf32>
    %23 = arith.truncf %21 : vector<8x128xf32> to vector<8x128xbf16>
    %c0_14 = arith.constant 0 : index
    %c0_15 = arith.constant 0 : index
    %24 = vector.load %arg5[%c0_14, %c0_15] : memref<128x128xbf16, #tpu.memory_space<vmem>>, vector<128x128xbf16>
    %cst_16 = arith.constant dense<0.000000e+00> : vector<8x128xf32>
    %25 = tpu.matmul %23, %24, %cst_16 {dimension_numbers = #tpu.dot_dimension_numbers<[1], [0], [0], [1], [0, 0, 1, 1], [], []>} : vector<8x128xbf16>, vector<128x128xbf16>, vector<8x128xf32> -> vector<8x128xf32>
    %26 = vector.broadcast %22 : vector<1x128xf32> to vector<8x128xf32>
    %27 = arith.addf %25, %26 : vector<8x128xf32>
    %28 = vector.extract_strided_slice %27 {offsets = [0, 0], sizes = [8, 32], strides = [1, 1]} : vector<8x128xf32> to vector<8x32xf32>
    %29 = vector.extract_strided_slice %27 {offsets = [0, 32], sizes = [8, 32], strides = [1, 1]} : vector<8x128xf32> to vector<8x32xf32>
    %cst_17 = arith.constant 5.000000e-01 : f32
    %30 = vector.broadcast %cst_17 : f32 to vector<8x32xf32>
    %31 = arith.mulf %30, %29 : vector<8x32xf32>
    %32 = math.exp %31 : vector<8x32xf32>
    %c0_18 = arith.constant 0 : index
    %c0_19 = arith.constant 0 : index
    %33 = vector.load %arg2[%c0_18, %c0_19] : memref<8x32xf32, #tpu.memory_space<vmem>>, vector<8x32xf32>
    %34 = arith.mulf %33, %32 : vector<8x32xf32>
    %35 = arith.addf %34, %28 : vector<8x32xf32>
    %c0_20 = arith.constant 0 : index
    %c512 = arith.constant 512 : index
    %36 = vector.load %arg9[%c0_20, %c512] : memref<1x1792xf32, #tpu.memory_space<vmem>>, vector<1x128xf32>
    %37 = arith.truncf %35 : vector<8x32xf32> to vector<8x32xbf16>
    %c0_21 = arith.constant 0 : index
    %c0_22 = arith.constant 0 : index
    %38 = vector.load %arg6[%c0_21, %c0_22] : memref<32x128xbf16, #tpu.memory_space<vmem>>, vector<32x128xbf16>
    %cst_23 = arith.constant dense<0.000000e+00> : vector<8x128xf32>
    %39 = tpu.matmul %37, %38, %cst_23 {dimension_numbers = #tpu.dot_dimension_numbers<[1], [0], [0], [1], [0, 0, 1, 1], [], []>} : vector<8x32xbf16>, vector<32x128xbf16>, vector<8x128xf32> -> vector<8x128xf32>
    %40 = vector.broadcast %36 : vector<1x128xf32> to vector<8x128xf32>
    %41 = arith.addf %39, %40 : vector<8x128xf32>
    %cst_24 = arith.constant 0.000000e+00 : f32
    %42 = vector.broadcast %cst_24 : f32 to vector<8x128xf32>
    %43 = arith.cmpf oge, %41, %42 : vector<8x128xf32>
    %cst_25 = arith.constant 1.000000e-01 : f32
    %44 = vector.broadcast %cst_25 : f32 to vector<8x128xf32>
    %45 = arith.mulf %44, %41 : vector<8x128xf32>
    %46 = arith.select %43, %41, %45 : vector<8x128xi1>, vector<8x128xf32>
    %c0_26 = arith.constant 0 : index
    %c640 = arith.constant 640 : index
    %47 = vector.load %arg9[%c0_26, %c640] : memref<1x1792xf32, #tpu.memory_space<vmem>>, vector<1x256xf32>
    %48 = arith.truncf %46 : vector<8x128xf32> to vector<8x128xbf16>
    %c0_27 = arith.constant 0 : index
    %c0_28 = arith.constant 0 : index
    %49 = vector.load %arg7[%c0_27, %c0_28] : memref<128x256xbf16, #tpu.memory_space<vmem>>, vector<128x256xbf16>
    %cst_29 = arith.constant dense<0.000000e+00> : vector<8x256xf32>
    %50 = tpu.matmul %48, %49, %cst_29 {dimension_numbers = #tpu.dot_dimension_numbers<[1], [0], [0], [1], [0, 0, 1, 1], [], []>} : vector<8x128xbf16>, vector<128x256xbf16>, vector<8x256xf32> -> vector<8x256xf32>
    %51 = vector.broadcast %47 : vector<1x256xf32> to vector<8x256xf32>
    %52 = arith.addf %50, %51 : vector<8x256xf32>
    %cst_30 = arith.constant 0.000000e+00 : f32
    %53 = vector.broadcast %cst_30 : f32 to vector<8x256xf32>
    %54 = arith.cmpf oge, %52, %53 : vector<8x256xf32>
    %cst_31 = arith.constant 1.000000e-01 : f32
    %55 = vector.broadcast %cst_31 : f32 to vector<8x256xf32>
    %56 = arith.mulf %55, %52 : vector<8x256xf32>
    %57 = arith.select %54, %52, %56 : vector<8x256xi1>, vector<8x256xf32>
    %c0_32 = arith.constant 0 : index
    %c896 = arith.constant 896 : index
    %58 = vector.load %arg9[%c0_32, %c896] : memref<1x1792xf32, #tpu.memory_space<vmem>>, vector<1x784xf32>
    %59 = arith.truncf %57 : vector<8x256xf32> to vector<8x256xbf16>
    %c0_33 = arith.constant 0 : index
    %c0_34 = arith.constant 0 : index
    %60 = vector.load %arg8[%c0_33, %c0_34] : memref<256x784xbf16, #tpu.memory_space<vmem>>, vector<256x784xbf16>
    %cst_35 = arith.constant dense<0.000000e+00> : vector<8x784xf32>
    %61 = tpu.matmul %59, %60, %cst_35 {dimension_numbers = #tpu.dot_dimension_numbers<[1], [0], [0], [1], [0, 0, 1, 1], [], []>} : vector<8x256xbf16>, vector<256x784xbf16>, vector<8x784xf32> -> vector<8x784xf32>
    %62 = vector.broadcast %58 : vector<1x784xf32> to vector<8x784xf32>
    %63 = arith.addf %61, %62 : vector<8x784xf32>
    %64 = arith.negf %63 : vector<8x784xf32>
    %65 = math.exp %64 : vector<8x784xf32>
    %cst_36 = arith.constant 1.000000e+00 : f32
    %66 = vector.broadcast %cst_36 : f32 to vector<8x784xf32>
    %67 = arith.addf %66, %65 : vector<8x784xf32>
    %68 = arith.divf %66, %67 : vector<8x784xf32>
    %c0_37 = arith.constant 0 : index
    %c0_38 = arith.constant 0 : index
    %69 = vector.load %arg10[%c0_37, %c0_38] : memref<8x784xf32, #tpu.memory_space<vmem>>, vector<8x784xf32>
    tpu.vector_store %arg10[%c0_37, %c0_38], %68 {strides = array<i32>} : memref<8x784xf32, #tpu.memory_space<vmem>>, vector<8x784xf32>,
    %c0_39 = arith.constant 0 : index
    %c0_40 = arith.constant 0 : index
    %70 = vector.load %arg11[%c0_39, %c0_40] : memref<8x128xf32, #tpu.memory_space<vmem>>, vector<8x128xf32>
    tpu.vector_store %arg11[%c0_39, %c0_40], %27 {strides = array<i32>} : memref<8x128xf32, #tpu.memory_space<vmem>>, vector<8x128xf32>,
    return
  }
  func.func @transform_0(%arg0: i32) -> (i32, i32) {
    %c0_i32 = arith.constant 0 : i32
    %c0_i32_0 = arith.constant 0 : i32
    return %arg0, %c0_i32 : i32, i32
  }
  func.func @transform_1(%arg0: i32) -> (i32, i32) {
    %c0_i32 = arith.constant 0 : i32
    %c0_i32_0 = arith.constant 0 : i32
    return %arg0, %c0_i32 : i32, i32
  }
  func.func @transform_2(%arg0: i32) -> (i32, i32) {
    %c0_i32 = arith.constant 0 : i32
    %c0_i32_0 = arith.constant 0 : i32
    %c0_i32_1 = arith.constant 0 : i32
    return %c0_i32, %c0_i32_0 : i32, i32
  }
  func.func @transform_3(%arg0: i32) -> (i32, i32) {
    %c0_i32 = arith.constant 0 : i32
    %c0_i32_0 = arith.constant 0 : i32
    %c0_i32_1 = arith.constant 0 : i32
    return %c0_i32, %c0_i32_0 : i32, i32
  }
  func.func @transform_4(%arg0: i32) -> (i32, i32) {
    %c0_i32 = arith.constant 0 : i32
    %c0_i32_0 = arith.constant 0 : i32
    %c0_i32_1 = arith.constant 0 : i32
    return %c0_i32, %c0_i32_0 : i32, i32
  }
  func.func @transform_5(%arg0: i32) -> (i32, i32) {
    %c0_i32 = arith.constant 0 : i32
    %c0_i32_0 = arith.constant 0 : i32
    %c0_i32_1 = arith.constant 0 : i32
    return %c0_i32, %c0_i32_0 : i32, i32
  }
  func.func @transform_6(%arg0: i32) -> (i32, i32) {
    %c0_i32 = arith.constant 0 : i32
    %c0_i32_0 = arith.constant 0 : i32
    %c0_i32_1 = arith.constant 0 : i32
    return %c0_i32, %c0_i32_0 : i32, i32
  }
  func.func @transform_7(%arg0: i32) -> (i32, i32) {
    %c0_i32 = arith.constant 0 : i32
    %c0_i32_0 = arith.constant 0 : i32
    %c0_i32_1 = arith.constant 0 : i32
    return %c0_i32, %c0_i32_0 : i32, i32
  }
  func.func @transform_8(%arg0: i32) -> (i32, i32) {
    %c0_i32 = arith.constant 0 : i32
    %c0_i32_0 = arith.constant 0 : i32
    %c0_i32_1 = arith.constant 0 : i32
    return %c0_i32, %c0_i32_0 : i32, i32
  }
  func.func @transform_9(%arg0: i32) -> (i32, i32) {
    %c0_i32 = arith.constant 0 : i32
    %c0_i32_0 = arith.constant 0 : i32
    return %arg0, %c0_i32 : i32, i32
  }
  func.func @transform_10(%arg0: i32) -> (i32, i32) {
    %c0_i32 = arith.constant 0 : i32
    %c0_i32_0 = arith.constant 0 : i32
    return %arg0, %c0_i32 : i32, i32
  }
}

</mosaic_0001>

<bundles_post_ra>
// kernel: vae_forward.1
= control target key start
LH: loop header
LB: loop body
LE: loop exit
PB: predicated region body
PF: predicated region fallthrough
CT: control target
= control target key end

     0   :  { %vm663_vm0 = vcmask 130048   ;;  %vm3099_vm3 = vmmov 0   ;;  %s3100_s12 = smov 96   ;;  %vm1163_vm5 = vcmask 261120   ;;  %s4037_s2 = inlined_call_operand.vmem [shape: bf16[784,256], index: 2, kind: input, shape index: {}]   ;;  %s4038_s0 = inlined_call_operand.vmem [shape: bf16[8,784], index: 0, kind: input, shape index: {}]   ;;  %s4039_s3 = inlined_call_operand.vmem [shape: bf16[256,128], index: 3, kind: input, shape index: {}]   ;;  %s4040_s4 = inlined_call_operand.vmem [shape: bf16[128,128], index: 4, kind: input, shape index: {}]   ;;  %s4041_s8 = inlined_call_operand.vmem [shape: f32[1,1792], index: 8, kind: input, shape index: {}]   ;;  %s4042_s10 = inlined_call_operand.vmem [shape: f32[8,128], index: 10, kind: output, shape index: {1}]   ;;  %s4043_s5 = inlined_call_operand.vmem [shape: bf16[32,128], index: 5, kind: input, shape index: {}]   ;;  %s4044_s6 = inlined_call_operand.vmem [shape: bf16[128,256], index: 6, kind: input, shape index: {}]   ;;  %s4045_s1 = inlined_call_operand.vmem [shape: f32[8,32], index: 1, kind: input, shape index: {}]   ;;  %s4046_s7 = inlined_call_operand.vmem [shape: bf16[256,784], index: 7, kind: input, shape index: {}]   ;;  %s4047_s9 = inlined_call_operand.vmem [shape: f32[8,784], index: 9, kind: output, shape index: {0}]  }
   0x1   :  { %v2703_v0 = vld [vmem:[%s4037_s2 + $0x4] ss:$8 sps:$4 sm:$0xff]   ;;  %v2705_v1 = vld [vmem:[%s4037_s2] ss:$8 sps:$4 sm:$0xff]   ;;  %v2706_v2 = vld [vmem:[%s4037_s2 + $0x14] ss:$8 sps:$4 sm:$0xff]  }
   0x2   :  { %667 = vmatprep.subr.bf16.mxu0 %v2703_v0  ;;  %v2708_v3 = vld [vmem:[%s4037_s2 + $0x10] ss:$8 sps:$4 sm:$0xff]   ;;  %v2709_v4 = vld [vmem:[%s4037_s2 + $0x24] ss:$8 sps:$4 sm:$0xff]   ;;  %v2711_v5 = vld [vmem:[%s4037_s2 + $0x20] ss:$8 sps:$4 sm:$0xff]  }
   0x3   :  { %668 = vmatpush1.bf16.msra.mxu0 %v2705_v1  ;;  %v2712_v6 = vld [vmem:[%s4037_s2 + $0x34] ss:$8 sps:$4 sm:$0xff]   ;;  %v2714_v7 = vld [vmem:[%s4037_s2 + $0x30] ss:$8 sps:$4 sm:$0xff]   ;;  %v2715_v8 = vld [vmem:[%s4037_s2 + $0x44] ss:$8 sps:$4 sm:$0xff]  }
   0x4   :  { %669 = vmatprep.subr.bf16.mxu0 %v2706_v2  ;;  %v2717_v9 = vld [vmem:[%s4037_s2 + $0x40] ss:$8 sps:$4 sm:$0xff]   ;;  %v2718_v10 = vld [vmem:[%s4037_s2 + $0x54] ss:$8 sps:$4 sm:$0xff]   ;;  %v2720_v11 = vld [vmem:[%s4037_s2 + $0x50] ss:$8 sps:$4 sm:$0xff]  }
   0x5   :  { %v2721_v12 = vld [vmem:[%s4037_s2 + $0x64] ss:$8 sps:$4 sm:$0xff]   ;;  %v2723_v15 = vld [vmem:[%s4037_s2 + $0x60] ss:$8 sps:$4 sm:$0xff]   ;;  %v2724_v16 = vld [vmem:[%s4037_s2 + $0x74] ss:$8 sps:$4 sm:$0xff]  }
   0x6   :  { %v35_v13 = vld [vmem:[%s4038_s0] sm:$0xff]  ;;  %v2726_v17 = vld [vmem:[%s4037_s2 + $0x70] ss:$8 sps:$4 sm:$0xff]   ;;  %v2730_v20 = vld [vmem:[%s4037_s2 + $0x94] ss:$8 sps:$4 sm:$0xff]  }
   0x7   :  { %670 = vmatpush1.bf16.msra.mxu0 %v2708_v3  ;;  %v2331_v14 = vcombine.high %v35_v13, %v35_v13  ;;  %v2727_v18 = vld [vmem:[%s4037_s2 + $0x84] ss:$8 sps:$4 sm:$0xff]   ;;  %v2729_v19 = vld [vmem:[%s4037_s2 + $0x80] ss:$8 sps:$4 sm:$0xff]   ;;  %v2732_v21 = vld [vmem:[%s4037_s2 + $0x90] ss:$8 sps:$4 sm:$0xff]   ;;  %v2330_v36 = vcombine.low %v35_v13, %v35_v13 }
   0x8   :  { %671 = vmatprep.subr.bf16.mxu0 %v2709_v4  ;;  %v2733_v22 = vld [vmem:[%s4037_s2 + $0xa4] ss:$8 sps:$4 sm:$0xff]   ;;  %v2735_v23 = vld [vmem:[%s4037_s2 + $0xa0] ss:$8 sps:$4 sm:$0xff]   ;;  %v2736_v24 = vld [vmem:[%s4037_s2 + $0xb4] ss:$8 sps:$4 sm:$0xff]  }
   0x9   :  { %699 = vmatprep.mubr.bf16.mxu0 %v2331_v14  ;;  %v2738_v25 = vld [vmem:[%s4037_s2 + $0xb0] ss:$8 sps:$4 sm:$0xff]   ;;  %v2739_v26 = vld [vmem:[%s4037_s2 + $0xc4] ss:$8 sps:$4 sm:$0xff]   ;;  %v2741_v27 = vld [vmem:[%s4037_s2 + $0xc0] ss:$8 sps:$4 sm:$0xff]  }
   0xa   :  { %v2742_v28 = vld [vmem:[%s4037_s2 + $0xd4] ss:$8 sps:$4 sm:$0xff]   ;;  %v2744_v29 = vld [vmem:[%s4037_s2 + $0xd0] ss:$8 sps:$4 sm:$0xff]   ;;  %v2745_v30 = vld [vmem:[%s4037_s2 + $0xe4] ss:$8 sps:$4 sm:$0xff]  }
   0xb   :  { %672 = vmatpush1.bf16.msra.mxu0 %v2711_v5  ;;  %v2747_v31 = vld [vmem:[%s4037_s2 + $0xe0] ss:$8 sps:$4 sm:$0xff]   ;;  %v2748_v32 = vld [vmem:[%s4037_s2 + $0xf4] ss:$8 sps:$4 sm:$0xff]   ;;  %v2750_v33 = vld [vmem:[%s4037_s2 + $0xf0] ss:$8 sps:$4 sm:$0xff]  }
   0xc   :  { %673 = vmatprep.subr.bf16.mxu0 %v2712_v6  ;;  %v2756_v34 = vld [vmem:[%s4037_s2 + $0x104] ss:$8 sps:$4 sm:$0xff]   ;;  %v2754_v37 = vld [vmem:[%s4037_s2 + $0x100] ss:$8 sps:$4 sm:$0xff]   ;;  %v2759_v39 = vld [vmem:[%s4037_s2 + $0x114] ss:$8 sps:$4 sm:$0xff]  }
   0xd   :  { %v3261_v35 = vld [vmem:[%s4038_s0 + $0x8] sm:$0xff]  ;;  %v2757_v40 = vld [vmem:[%s4037_s2 + $0x110] ss:$8 sps:$4 sm:$0xff]   ;;  %v2765_v43 = vld [vmem:[%s4037_s2 + $0x134] ss:$8 sps:$4 sm:$0xff]  }
   0xe   :  { %v2333_v38 = vcombine.high %v3261_v35, %v3261_v35  ;;  %v2762_v41 = vld [vmem:[%s4037_s2 + $0x124] ss:$8 sps:$4 sm:$0xff]   ;;  %v2760_v42 = vld [vmem:[%s4037_s2 + $0x120] ss:$8 sps:$4 sm:$0xff]   ;;  %v2763_v44 = vld [vmem:[%s4037_s2 + $0x130] ss:$8 sps:$4 sm:$0xff]  }
   0xf   :  { %674 = vmatpush1.bf16.msra.mxu0 %v2714_v7  ;;  %v2768_v45 = vld [vmem:[%s4037_s2 + $0x144] ss:$8 sps:$4 sm:$0xff]   ;;  %v2766_v46 = vld [vmem:[%s4037_s2 + $0x140] ss:$8 sps:$4 sm:$0xff]   ;;  %v2771_v47 = vld [vmem:[%s4037_s2 + $0x154] ss:$8 sps:$4 sm:$0xff]  }
  0x10   :  { %675 = vmatprep.subr.bf16.mxu0 %v2715_v8  ;;  %v2857_v48 = vld [vmem:[%s4039_s3 + $0x40] sm:$0xff]   ;;  %v2769_v50 = vld [vmem:[%s4037_s2 + $0x150] ss:$8 sps:$4 sm:$0xff]   ;;  %v2859_v51 = vld [vmem:[%s4039_s3 + $0x48] sm:$0xff]  }
  0x11   :  { %v2858_v49 = vld [vmem:[%s4039_s3] sm:$0xff]   ;;  %2601 = vmatprep.subr.bf16.mxu1 %v2857_v48  ;;  %v2860_v52 = vld [vmem:[%s4039_s3 + $0x8] sm:$0xff]   ;;  %v2861_v53 = vld [vmem:[%s4039_s3 + $0x50] sm:$0xff]  }
  0x12   :  { %2602 = vmatpush3.bf16.msra.mxu1 %v2858_v49  ;;  %v2774_v54 = vld [vmem:[%s4037_s2 + $0x164] ss:$8 sps:$4 sm:$0xff]   ;;  %v2772_v55 = vld [vmem:[%s4037_s2 + $0x160] ss:$8 sps:$4 sm:$0xff]   ;;  %v2862_v56 = vld [vmem:[%s4039_s3 + $0x10] sm:$0xff]  }
  0x13   :  { %676 = vmatpush1.bf16.msra.mxu0 %v2717_v9  ;;  %2603 = vmatprep.subr.bf16.mxu1 %v2859_v51  ;;  %v2863_v57 = vld [vmem:[%s4039_s3 + $0x58] sm:$0xff]   ;;  %v2780_v60 = vld [vmem:[%s4037_s2 + $0x184] ss:$8 sps:$4 sm:$0xff]   ;;  %v2778_v0 = vld [vmem:[%s4037_s2 + $0x180] ss:$8 sps:$4 sm:$0xff]  }
  0x14   :  { %677 = vmatprep.subr.bf16.mxu0 %v2718_v10  ;;  %v2777_v58 = vld [vmem:[%s4037_s2 + $0x174] ss:$8 sps:$4 sm:$0xff]   ;;  %v2775_v59 = vld [vmem:[%s4037_s2 + $0x170] ss:$8 sps:$4 sm:$0xff]   ;;  %v2865_v62 = vld [vmem:[%s4039_s3 + $0x60] sm:$0xff]  }
  0x15   :  { %v2864_v61 = vld [vmem:[%s4039_s3 + $0x18] sm:$0xff]   ;;  %v2866_v63 = vld [vmem:[%s4039_s3 + $0x20] sm:$0xff]   ;;  %v2867_v1 = vld [vmem:[%s4039_s3 + $0x68] sm:$0xff]  }
  0x16   :  { %2604 = vmatpush3.bf16.msra.mxu1 %v2860_v52  ;;  %v2783_v2 = vld [vmem:[%s4037_s2 + $0x194] ss:$8 sps:$4 sm:$0xff]   ;;  %v2868_v3 = vld [vmem:[%s4039_s3 + $0x28] sm:$0xff]   ;;  %v2781_v4 = vld [vmem:[%s4037_s2 + $0x190] ss:$8 sps:$4 sm:$0xff]  }
  0x17   :  { %678 = vmatpush1.bf16.msra.mxu0 %v2720_v11  ;;  %2605 = vmatprep.subr.bf16.mxu1 %v2861_v53  ;;  %v2786_v5 = vld [vmem:[%s4037_s2 + $0x1a4] ss:$8 sps:$4 sm:$0xff]   ;;  %v2784_v6 = vld [vmem:[%s4037_s2 + $0x1a0] ss:$8 sps:$4 sm:$0xff]   ;;  %v2789_v7 = vld [vmem:[%s4037_s2 + $0x1b4] ss:$8 sps:$4 sm:$0xff]  }
  0x18   :  { %679 = vmatprep.subr.bf16.mxu0 %v2721_v12  ;;  %v2787_v8 = vld [vmem:[%s4037_s2 + $0x1b0] ss:$8 sps:$4 sm:$0xff]   ;;  %v2792_v9 = vld [vmem:[%s4037_s2 + $0x1c4] ss:$8 sps:$4 sm:$0xff]   ;;  %v2790_v10 = vld [vmem:[%s4037_s2 + $0x1c0] ss:$8 sps:$4 sm:$0xff]  }
  0x19   :  { %v2795_v11 = vld [vmem:[%s4037_s2 + $0x1d4] ss:$8 sps:$4 sm:$0xff]   ;;  %v2793_v12 = vld [vmem:[%s4037_s2 + $0x1d0] ss:$8 sps:$4 sm:$0xff]   ;;  %v2798_v13 = vld [vmem:[%s4037_s2 + $0x1e4] ss:$8 sps:$4 sm:$0xff]  }
  0x1a   :  { %2606 = vmatpush3.bf16.msra.mxu1 %v2862_v56  ;;  %v2796_v14 = vld [vmem:[%s4037_s2 + $0x1e0] ss:$8 sps:$4 sm:$0xff]   ;;  %v2848_v48 = vld [vmem:[%s4037_s2 + $0x2e4] ss:$8 sps:$4 sm:$0xff]   ;;  %v2849_v51 = vld [vmem:[%s4037_s2 + $0x2f0] ss:$8 sps:$4 sm:$0xff]  }
  0x1b   :  { %680 = vmatpush1.bf16.msra.mxu0 %v2723_v15  ;;  %2607 = vmatprep.subr.bf16.mxu1 %v2863_v57  ;;  %v2801_v15 = vld [vmem:[%s4037_s2 + $0x1f4] ss:$8 sps:$4 sm:$0xff]   ;;  %v2846_v49 = vld [vmem:[%s4037_s2 + $0x2e0] ss:$8 sps:$4 sm:$0xff]   ;;  %v2856_v52 = vld [vmem:[%s4037_s2 + $0x304] ss:$8 sps:$4 sm:$0xff]  }
  0x1c   :  { %681 = vmatprep.subr.bf16.mxu0 %v2724_v16  ;;  %v2799_v16 = vld [vmem:[%s4037_s2 + $0x1f0] ss:$8 sps:$4 sm:$0xff]  }
  0x1d   :  { %v2753_v56 = vld [vmem:[%s4038_s0 + $0x18] ss:$0 sps:$4 sm:$0xff]   ;;  %v2869_v57 = vld [vmem:[%s4039_s3 + $0x70] sm:$0xff]  }
  0x1e   :  { %2608 = vmatpush3.bf16.msra.mxu1 %v2864_v61  ;;  %v3098_v61 = vmov 0.0  }
  0x1f   :  { %682 = vmatpush1.bf16.msra.mxu0 %v2726_v17  ;;  %2609 = vmatprep.subr.bf16.mxu1 %v2865_v62  ;;  %v2806_v17 = vld [vmem:[%s4037_s2 + $0x204] ss:$8 sps:$4 sm:$0xff]   ;;  %v139_v62 = vlaneseq }
  0x20   :  { %683 = vmatprep.subr.bf16.mxu0 %v2727_v18  ;;  %v3400_v18 = vld [vmem:[%s4038_s0 + $0x10] sm:$0xff] }
  0x21   :  { %v2334_v53 = vcombine.low %v3400_v18, %v3400_v18 }
  0x22   :  { %2610 = vmatpush3.bf16.msra.mxu1 %v2866_v63  ;;  %v3525_v63 = vshrl.u32 %v139_v62, 7  ;;  %v2898_v62 = vld [vmem:[%s4044_s6 + $0x50] ss:$8 sps:$4 sm:$0xff]  }
  0x23   :  { %684 = vmatpush1.bf16.msra.mxu0 %v2729_v19  ;;  %2611 = vmatprep.subr.bf16.mxu1 %v2867_v1  ;;  %v2332_v19 = vcombine.low %v3261_v35, %v3261_v35  ;;  %v2825_v35 = vld [vmem:[%s4037_s2 + $0x270] ss:$8 sps:$4 sm:$0xff]   ;;  %v39_v1 = vld [vmem:[%s4041_s8] sm:$0x3] }
  0x24   :  { %685 = vmatprep.subr.bf16.mxu0 %v2730_v20  ;;  %v2804_v20 = vld [vmem:[%s4037_s2 + $0x200] ss:$8 sps:$4 sm:$0xff]  }
  0x26   :  { %2612 = vmatpush3.bf16.msra.mxu1 %v2868_v3 }
  0x27   :  { %686 = vmatpush1.bf16.msra.mxu0 %v2732_v21  ;;  %v2335_v21 = vcombine.high %v3400_v18, %v3400_v18  ;;  %2613 = vmatprep.subr.bf16.mxu1 %v2869_v57  ;;  %v2874_v18 = vld [vmem:[%s4040_s4 + $0x8] sm:$0xff]  }
  0x28   :  { %687 = vmatprep.subr.bf16.mxu0 %v2733_v22  ;;  %v2809_v22 = vld [vmem:[%s4037_s2 + $0x214] ss:$8 sps:$4 sm:$0xff]   ;;  %v2889_v57 = vld [vmem:[%s4044_s6 + $0x20] ss:$8 sps:$4 sm:$0xff]  }
  0x2b   :  { %688 = vmatpush1.bf16.msra.mxu0 %v2735_v23  ;;  %v2807_v23 = vld [vmem:[%s4037_s2 + $0x210] ss:$8 sps:$4 sm:$0xff]  }
  0x2c   :  { %689 = vmatprep.subr.bf16.mxu0 %v2736_v24  ;;  %v2812_v24 = vld [vmem:[%s4037_s2 + $0x224] ss:$8 sps:$4 sm:$0xff]  }
  0x2f   :  { %690 = vmatpush1.bf16.msra.mxu0 %v2738_v25  ;;  %v2810_v25 = vld [vmem:[%s4037_s2 + $0x220] ss:$8 sps:$4 sm:$0xff]  }
  0x30   :  { %691 = vmatprep.subr.bf16.mxu0 %v2739_v26  ;;  %v2815_v26 = vld [vmem:[%s4037_s2 + $0x234] ss:$8 sps:$4 sm:$0xff]  }
  0x33   :  { %692 = vmatpush1.bf16.msra.mxu0 %v2741_v27  ;;  %v2813_v27 = vld [vmem:[%s4037_s2 + $0x230] ss:$8 sps:$4 sm:$0xff]  }
  0x34   :  { %693 = vmatprep.subr.bf16.mxu0 %v2742_v28  ;;  %v2818_v28 = vld [vmem:[%s4037_s2 + $0x244] ss:$8 sps:$4 sm:$0xff]  }
  0x37   :  { %694 = vmatpush1.bf16.msra.mxu0 %v2744_v29  ;;  %v2816_v29 = vld [vmem:[%s4037_s2 + $0x240] ss:$8 sps:$4 sm:$0xff]  }
  0x38   :  { %695 = vmatprep.subr.bf16.mxu0 %v2745_v30  ;;  %v2821_v30 = vld [vmem:[%s4037_s2 + $0x254] ss:$8 sps:$4 sm:$0xff]  }
  0x3b   :  { %696 = vmatpush1.bf16.msra.mxu0 %v2747_v31  ;;  %v2819_v31 = vld [vmem:[%s4037_s2 + $0x250] ss:$8 sps:$4 sm:$0xff]  }
  0x3c   :  { %697 = vmatprep.subr.bf16.mxu0 %v2748_v32  ;;  %v2824_v32 = vld [vmem:[%s4037_s2 + $0x264] ss:$8 sps:$4 sm:$0xff]  }
  0x3f   :  { %698 = vmatpush1.bf16.msra.mxu0 %v2750_v33  ;;  %v2822_v33 = vld [vmem:[%s4037_s2 + $0x260] ss:$8 sps:$4 sm:$0xff]  }
  0x40   :  { %708 = vmatprep.subr.bf16.mxu0 %v2756_v34  ;;  %v2827_v34 = vld [vmem:[%s4037_s2 + $0x274] ss:$8 sps:$4 sm:$0xff]  }
  0x42   :  { %700 = vmatmul.mubr.bf16.vlgmr.msra.gmra.mrb[0].mxu0 %v2330_v36  ;;  %v2830_v36 = vld [vmem:[%s4037_s2 + $0x284] ss:$8 sps:$4 sm:$0xff]  }
  0x43   :  { %709 = vmatpush1.bf16.msra.mxu0 %v2754_v37  ;;  %740 = vmatprep.mubr.bf16.mxu0 %v2333_v38  ;;  %v2828_v37 = vld [vmem:[%s4037_s2 + $0x280] ss:$8 sps:$4 sm:$0xff]   ;;  %v2833_v38 = vld [vmem:[%s4037_s2 + $0x294] ss:$8 sps:$4 sm:$0xff]  }
  0x44   :  { %710 = vmatprep.subr.bf16.mxu0 %v2759_v39  ;;  %v2831_v39 = vld [vmem:[%s4037_s2 + $0x290] ss:$8 sps:$4 sm:$0xff]  }
  0x47   :  { %711 = vmatpush1.bf16.msra.mxu0 %v2757_v40  ;;  %v2836_v40 = vld [vmem:[%s4037_s2 + $0x2a4] ss:$8 sps:$4 sm:$0xff]  }
  0x48   :  { %712 = vmatprep.subr.bf16.mxu0 %v2762_v41  ;;  %v2834_v41 = vld [vmem:[%s4037_s2 + $0x2a0] ss:$8 sps:$4 sm:$0xff]  }
  0x4b   :  { %713 = vmatpush1.bf16.msra.mxu0 %v2760_v42  ;;  %v2839_v42 = vld [vmem:[%s4037_s2 + $0x2b4] ss:$8 sps:$4 sm:$0xff]  }
  0x4c   :  { %714 = vmatprep.subr.bf16.mxu0 %v2765_v43  ;;  %v2837_v43 = vld [vmem:[%s4037_s2 + $0x2b0] ss:$8 sps:$4 sm:$0xff]  }
  0x4f   :  { %715 = vmatpush1.bf16.msra.mxu0 %v2763_v44  ;;  %v2842_v44 = vld [vmem:[%s4037_s2 + $0x2c4] ss:$8 sps:$4 sm:$0xff]  }
  0x50   :  { %716 = vmatprep.subr.bf16.mxu0 %v2768_v45  ;;  %v2840_v45 = vld [vmem:[%s4037_s2 + $0x2c0] ss:$8 sps:$4 sm:$0xff]  }
  0x53   :  { %717 = vmatpush1.bf16.msra.mxu0 %v2766_v46  ;;  %v2845_v46 = vld [vmem:[%s4037_s2 + $0x2d4] ss:$8 sps:$4 sm:$0xff]  }
  0x54   :  { %718 = vmatprep.subr.bf16.mxu0 %v2771_v47  ;;  %v2843_v47 = vld [vmem:[%s4037_s2 + $0x2d0] ss:$8 sps:$4 sm:$0xff]  }
  0x57   :  { %719 = vmatpush1.bf16.msra.mxu0 %v2769_v50  ;;  %v2851_v50 = vld [vmem:[%s4037_s2 + $0x2f4] ss:$8 sps:$4 sm:$0xff]  }
  0x58   :  { %720 = vmatprep.subr.bf16.mxu0 %v2774_v54  ;;  %v2854_v54 = vld [vmem:[%s4037_s2 + $0x300] ss:$8 sps:$4 sm:$0xff]  }
  0x5b   :  { %721 = vmatpush1.bf16.msra.mxu0 %v2772_v55  ;;  %v3097_v55 = vmov 0  }
  0x5c   :  { %722 = vmatprep.subr.bf16.mxu0 %v2777_v58  ;;  %v2870_v58 = vld [vmem:[%s4039_s3 + $0x30] sm:$0xff]  }
  0x5d   :  { %2614 = vmatpush3.bf16.msra.mxu1 %v2870_v58  ;;  %v2894_v58 = vld [vmem:[%s4044_s6 + $0x34] ss:$8 sps:$4 sm:$0xff]  }
  0x5f   :  { %723 = vmatpush1.bf16.msra.mxu0 %v2775_v59  ;;  %v2871_v59 = vld [vmem:[%s4039_s3 + $0x78] sm:$0xff]  }
  0x60   :  { %724 = vmatprep.subr.bf16.mxu0 %v2780_v60  ;;  %v2872_v60 = vld [vmem:[%s4039_s3 + $0x38] sm:$0xff]   ;;  %2615 = vmatprep.subr.bf16.mxu1 %v2871_v59  ;;  %v2897_v59 = vld [vmem:[%s4044_s6 + $0x44] ss:$8 sps:$4 sm:$0xff]  }
  0x61   :  { %2616 = vmatpush3.bf16.msra.mxu1 %v2872_v60  ;;  %v2895_v60 = vld [vmem:[%s4044_s6 + $0x40] ss:$8 sps:$4 sm:$0xff]  }
  0x62   :  { %2657 = vmatprep.subr.bf16.mxu1 %v3098_v61 }
  0x63   :  { %725 = vmatpush1.bf16.msra.mxu0 %v2778_v0  ;;  %v3528_v0 = vsub.s32 0, %v3525_v63 }
  0x64   :  { %726 = vmatprep.subr.bf16.mxu0 %v2783_v2  ;;  %v3534_v2 = vsub.s32 1, %v3525_v63 }
  0x65   :  { %v142_v3 = vrot.slane %v39_v1, %v3528_v0 }
  0x67   :  { %727 = vmatpush1.bf16.msra.mxu0 %v2781_v4  ;;  %v146_v4 = vrot.slane %v39_v1, %v3534_v2  ;;  %v2903_v1 = vld [vmem:[%s4044_s6 + $0x64] ss:$8 sps:$4 sm:$0xff]  }
  0x68   :  { %728 = vmatprep.subr.bf16.mxu0 %v2786_v5 }
  0x6b   :  { %729 = vmatpush1.bf16.msra.mxu0 %v2784_v6 }
  0x6c   :  { %730 = vmatprep.subr.bf16.mxu0 %v2789_v7 }
  0x6f   :  { %731 = vmatpush1.bf16.msra.mxu0 %v2787_v8 }
  0x70   :  { %732 = vmatprep.subr.bf16.mxu0 %v2792_v9 }
  0x73   :  { %733 = vmatpush1.bf16.msra.mxu0 %v2790_v10 }
  0x74   :  { %734 = vmatprep.subr.bf16.mxu0 %v2795_v11 }
  0x77   :  { %735 = vmatpush1.bf16.msra.mxu0 %v2793_v12 }
  0x78   :  { %736 = vmatprep.subr.bf16.mxu0 %v2798_v13 }
  0x7b   :  { %737 = vmatpush1.bf16.msra.mxu0 %v2796_v14 }
  0x7c   :  { %738 = vmatprep.subr.bf16.mxu0 %v2801_v15 }
  0x7f   :  { %739 = vmatpush1.bf16.msra.mxu0 %v2799_v16  ;;  %v2873_v16 = vld [vmem:[%s4040_s4] sm:$0xff]  }
  0x80   :  { %749 = vmatprep.subr.bf16.mxu0 %v2806_v17 }
  0x82   :  { %741 = vmatmul.mubr.bf16.vlgmr.msra.gmra.mrb[0].mxu0 %v2332_v19  ;;  %v2875_v19 = vld [vmem:[%s4040_s4 + $0x10] sm:$0xff]  }
  0x83   :  { %750 = vmatpush1.bf16.msra.mxu0 %v2804_v20  ;;  %781 = vmatprep.mubr.bf16.mxu0 %v2335_v21  ;;  %v2876_v20 = vld [vmem:[%s4040_s4 + $0x18] sm:$0xff]   ;;  %v2877_v21 = vld [vmem:[%s4040_s4 + $0x20] sm:$0xff]  }
  0x84   :  { %751 = vmatprep.subr.bf16.mxu0 %v2809_v22  ;;  %v2878_v22 = vld [vmem:[%s4040_s4 + $0x28] sm:$0xff]  }
  0x87   :  { %752 = vmatpush1.bf16.msra.mxu0 %v2807_v23  ;;  %v2879_v23 = vld [vmem:[%s4040_s4 + $0x30] sm:$0xff]  }
  0x88   :  { %753 = vmatprep.subr.bf16.mxu0 %v2812_v24  ;;  %v2880_v24 = vld [vmem:[%s4040_s4 + $0x38] sm:$0xff]  }
  0x8b   :  { %754 = vmatpush1.bf16.msra.mxu0 %v2810_v25 }
  0x8c   :  { %755 = vmatprep.subr.bf16.mxu0 %v2815_v26  ;;  %v2436_v26 = vld [vmem:[%s4041_s8 + $0x2] ss:$0 sm:$0xff] }
  0x8f   :  { %756 = vmatpush1.bf16.msra.mxu0 %v2813_v27 }
  0x90   :  { %757 = vmatprep.subr.bf16.mxu0 %v2818_v28 }
  0x93   :  { %758 = vmatpush1.bf16.msra.mxu0 %v2816_v29 }
  0x94   :  { %759 = vmatprep.subr.bf16.mxu0 %v2821_v30 }
  0x97   :  { %760 = vmatpush1.bf16.msra.mxu0 %v2819_v31 }
  0x98   :  { %761 = vmatprep.subr.bf16.mxu0 %v2824_v32 }
  0x9b   :  { %762 = vmatpush1.bf16.msra.mxu0 %v2822_v33 }
  0x9c   :  { %763 = vmatprep.subr.bf16.mxu0 %v2827_v34 }
  0x9f   :  { %764 = vmatpush1.bf16.msra.mxu0 %v2825_v35  ;;  %v2453_v35 = vld [vmem:[%s4041_s8 + $0x3] ss:$0 sm:$0xff] }
  0xa0   :  { %765 = vmatprep.subr.bf16.mxu0 %v2830_v36 }
  0xa3   :  { %766 = vmatpush1.bf16.msra.mxu0 %v2828_v37 }
  0xa4   :  { %767 = vmatprep.subr.bf16.mxu0 %v2833_v38 }
  0xa7   :  { %768 = vmatpush1.bf16.msra.mxu0 %v2831_v39 }
  0xa8   :  { %769 = vmatprep.subr.bf16.mxu0 %v2836_v40  ;;  %v2881_v40 = vld [vmem:[%s4043_s5] sm:$0xff]  }
  0xab   :  { %770 = vmatpush1.bf16.msra.mxu0 %v2834_v41 }
  0xac   :  { %771 = vmatprep.subr.bf16.mxu0 %v2839_v42 }
  0xaf   :  { %772 = vmatpush1.bf16.msra.mxu0 %v2837_v43 }
  0xb0   :  { %773 = vmatprep.subr.bf16.mxu0 %v2842_v44  ;;  %v2882_v44 = vld [vmem:[%s4043_s5 + $0x8] sm:$0xff]  }
  0xb3   :  { %774 = vmatpush1.bf16.msra.mxu0 %v2840_v45  ;;  %v2885_v45 = vld [vmem:[%s4044_s6 + $0x4] ss:$8 sps:$4 sm:$0xff]  }
  0xb4   :  { %775 = vmatprep.subr.bf16.mxu0 %v2845_v46 }
  0xb7   :  { %776 = vmatpush1.bf16.msra.mxu0 %v2843_v47  ;;  %v1132_v47 = vld [vmem:[%s4045_s1] sm:$0xff] }
  0xb8   :  { %777 = vmatprep.subr.bf16.mxu0 %v2848_v48 }
  0xbb   :  { %778 = vmatpush1.bf16.msra.mxu0 %v2846_v49 }
  0xbc   :  { %779 = vmatprep.subr.bf16.mxu0 %v2851_v50 }
  0xbf   :  { %780 = vmatpush1.bf16.msra.mxu0 %v2849_v51  ;;  %v2883_v51 = vld [vmem:[%s4044_s6] ss:$8 sps:$4 sm:$0xff]  }
  0xc0   :  { %790 = vmatprep.subr.bf16.mxu0 %v2856_v52 }
  0xc2   :  { %782 = vmatmul.mubr.bf16.vlgmr.msra.gmra.mrb[0].mxu0 %v2334_v53  ;;  %v2888_v53 = vld [vmem:[%s4044_s6 + $0x14] ss:$8 sps:$4 sm:$0xff]  }
  0xc3   :  { %791 = vmatpush1.bf16.msra.mxu0 %v2854_v54  ;;  %822 = vmatprep.mubr.bf16.mxu0 %v3097_v55  ;;  %v2886_v54 = vld [vmem:[%s4044_s6 + $0x10] ss:$8 sps:$4 sm:$0xff]  }
  0xce   :  { %2435 = vmatmul.mubr.msk.bf16.vlgmr.msra.gmra.mrb[0].mxu0 %vm663_vm0, %v2753_v56  ;;  %v2891_v56 = vld [vmem:[%s4044_s6 + $0x24] ss:$8 sps:$4 sm:$0xff]  }
 0x1a1   :  { %v824_v5 = vpop.f32.mrb[0].mxu0 }
 0x1a2   :  { %v2685_v6 = vadd.f32 %v824_v5, %v142_v3  ;;  %v826_v7 = vpop.f32.mrb[1].mxu0  ;;  %v2901_v3 = vld [vmem:[%s4044_s6 + $0x60] ss:$8 sps:$4 sm:$0xff]   ;;  %v2904_v5 = vld [vmem:[%s4044_s6 + $0x70] ss:$8 sps:$4 sm:$0xff]  }
 0x1a3   :  { %v2686_v8 = vadd.f32 %v826_v7, %v146_v4  ;;  %v828_v9 = vpop.f32.mrb[2].mxu0  ;;  %v2906_v4 = vld [vmem:[%s4044_s6 + $0x74] ss:$8 sps:$4 sm:$0xff]   ;;  %v2910_v7 = vld [vmem:[%s4046_s7 + $0x10] ss:$28 sps:$4 sm:$0xff]  }
 0x1a4   :  { %vm831_vm1 = vcmp.ge.f32.partialorder %v2685_v6, 0.0  ;;  %v833_v10 = vmul.f32 0.1, %v2685_v6  ;;  %v829_v11 = vpop.f32.mrb[3].mxu0  ;;  %v2916_v9 = vld [vmem:[%s4046_s7 + $0x48] ss:$28 sps:$4 sm:$0xff]  }
 0x1a5   :  { %vm832_vm2 = vcmp.ge.f32.partialorder %v2686_v8, 0.0  ;;  %v834_v12 = vmul.f32 0.1, %v2686_v8  ;;  %v2924_v11 = vld [vmem:[%s4046_s7 + $0x84] ss:$28 sps:$4 sm:$0xff]  }
 0x1a6   :  { %v835_v13 = vsel %vm831_vm1, %v2685_v6, %v833_v10  ;;  %v2909_v6 = vld [vmem:[%s4046_s7 + $0x4] ss:$28 sps:$4 sm:$0xff]   ;;  %v2918_v10 = vld [vmem:[%s4046_s7 + $0x4c] ss:$28 sps:$4 sm:$0xff]  }
 0x1a7   :  { %v836_v14 = vsel %vm832_vm2, %v2686_v8, %v834_v12  ;;  %v838_v17 = vpack.c.bf16 %v835_v13, %v835_v13  ;;  %v2912_v8 = vld [vmem:[%s4046_s7 + $0x14] ss:$28 sps:$4 sm:$0xff]   ;;  %v2922_v12 = vld [vmem:[%s4046_s7 + $0x80] ss:$28 sps:$4 sm:$0xff]  }
 0x1a8   :  { %v839_v15 = vpack.c.bf16 %v836_v14, %v836_v14  ;;  %2191 = vmatprep.subr.bf16.mxu0 %v2912_v8  ;;  %v2930_v13 = vld [vmem:[%s4046_s7 + $0xbc] ss:$28 sps:$4 sm:$0xff]  }
 0x1a9   :  { %2192 = vmatpush1.bf16.msra.mxu0 %v2910_v7  ;;  %v2928_v14 = vld [vmem:[%s4046_s7 + $0xb8] ss:$28 sps:$4 sm:$0xff]   ;;  %v2979_v7 = vld [vmem:[%s4046_s7 + $0x2a0] ss:$28 sps:$4 sm:$0xff]  }
 0x1aa   :  { %1006 = vmatprep.mubr.bf16.mxu1 %v839_v15  ;;  %2193 = vmatprep.subr.bf16.mxu0 %v2918_v10  ;;  %v2936_v15 = vld [vmem:[%s4046_s7 + $0xf4] ss:$28 sps:$4 sm:$0xff]   ;;  %v2987_v8 = vld [vmem:[%s4046_s7 + $0x2dc] ss:$28 sps:$4 sm:$0xff]  }
 0x1ab   :  { %1007 = vmatmul.mubr.bf16.vlgmr.msra.gmra.mrb[0].mxu1 %v838_v17  ;;  %v2942_v17 = vld [vmem:[%s4046_s7 + $0x12c] ss:$28 sps:$4 sm:$0xff]   ;;  %v2993_v10 = vld [vmem:[%s4046_s7 + $0x314] ss:$28 sps:$4 sm:$0xff]  }
 0x1ac   :  { %2658 = vmatpush3.bf16.msra.mxu1 %v2873_v16  ;;  %2673 = vmatprep.mubr.msk.bf16.mxu1 %vm3099_vm3, %v3098_v61  ;;  %v2934_v16 = vld [vmem:[%s4046_s7 + $0xf0] ss:$28 sps:$4 sm:$0xff]  }
 0x1ad   :  { %2659 = vmatprep.subr.bf16.mxu1 %v3098_v61  ;;  %2194 = vmatpush1.bf16.msra.mxu0 %v2916_v9  ;;  %v2985_v9 = vld [vmem:[%s4046_s7 + $0x2d8] ss:$28 sps:$4 sm:$0xff]  }
 0x1ae   :  { %2195 = vmatprep.subr.bf16.mxu0 %v2924_v11  ;;  %v2991_v11 = vld [vmem:[%s4046_s7 + $0x310] ss:$28 sps:$4 sm:$0xff]  }
 0x1b0   :  { %2660 = vmatpush3.bf16.msra.mxu1 %v2874_v18  ;;  %v2940_v18 = vld [vmem:[%s4046_s7 + $0x128] ss:$28 sps:$4 sm:$0xff]  }
 0x1b1   :  { %2661 = vmatprep.subr.bf16.mxu1 %v3098_v61  ;;  %2196 = vmatpush1.bf16.msra.mxu0 %v2922_v12  ;;  %v2996_v12 = vld [vmem:[%s4046_s7 + $0x324] ss:$28 sps:$4 sm:$0xff]  }
 0x1b2   :  { %2197 = vmatprep.subr.bf16.mxu0 %v2930_v13  ;;  %v2994_v13 = vld [vmem:[%s4046_s7 + $0x320] ss:$28 sps:$4 sm:$0xff]  }
 0x1b4   :  { %2662 = vmatpush3.bf16.msra.mxu1 %v2875_v19  ;;  %v2948_v19 = vld [vmem:[%s4046_s7 + $0x164] ss:$28 sps:$4 sm:$0xff]  }
 0x1b5   :  { %2663 = vmatprep.subr.bf16.mxu1 %v3098_v61  ;;  %2198 = vmatpush1.bf16.msra.mxu0 %v2928_v14  ;;  %v2999_v14 = vld [vmem:[%s4046_s7 + $0x34c] ss:$28 sps:$4 sm:$0xff]  }
 0x1b6   :  { %2199 = vmatprep.subr.bf16.mxu0 %v2936_v15  ;;  %v2997_v15 = vld [vmem:[%s4046_s7 + $0x348] ss:$28 sps:$4 sm:$0xff]  }
 0x1b8   :  { %2664 = vmatpush3.bf16.msra.mxu1 %v2876_v20  ;;  %v2946_v20 = vld [vmem:[%s4046_s7 + $0x160] ss:$28 sps:$4 sm:$0xff]  }
 0x1b9   :  { %2665 = vmatprep.subr.bf16.mxu1 %v3098_v61  ;;  %2200 = vmatpush1.bf16.msra.mxu0 %v2934_v16  ;;  %v3002_v16 = vld [vmem:[%s4046_s7 + $0x35c] ss:$28 sps:$4 sm:$0xff]  }
 0x1ba   :  { %2201 = vmatprep.subr.bf16.mxu0 %v2942_v17  ;;  %v3000_v17 = vld [vmem:[%s4046_s7 + $0x358] ss:$28 sps:$4 sm:$0xff]  }
 0x1bc   :  { %2666 = vmatpush3.bf16.msra.mxu1 %v2877_v21  ;;  %v2954_v21 = vld [vmem:[%s4046_s7 + $0x19c] ss:$28 sps:$4 sm:$0xff]  }
 0x1bd   :  { %2667 = vmatprep.subr.bf16.mxu1 %v3098_v61  ;;  %2202 = vmatpush1.bf16.msra.mxu0 %v2940_v18  ;;  %v3005_v18 = vld [vmem:[%s4046_s7 + $0xc] ss:$28 sps:$4 sm:$0xff]  }
 0x1be   :  { %2203 = vmatprep.subr.bf16.mxu0 %v2948_v19  ;;  %v1210_v19 = vld [vmem:[%s4041_s8 + $0x5] sm:$0x3] }
 0x1c0   :  { %2668 = vmatpush3.bf16.msra.mxu1 %v2878_v22  ;;  %v2952_v22 = vld [vmem:[%s4046_s7 + $0x198] ss:$28 sps:$4 sm:$0xff]  }
 0x1c1   :  { %2669 = vmatprep.subr.bf16.mxu1 %v3098_v61  ;;  %2204 = vmatpush1.bf16.msra.mxu0 %v2946_v20  ;;  %v1232_v20 = vrot.slane %v1210_v19, %v3528_v0 }
 0x1c2   :  { %2205 = vmatprep.subr.bf16.mxu0 %v2954_v21  ;;  %v1236_v21 = vrot.slane %v1210_v19, %v3534_v2  ;;  %v3066_v19 = vld [vmem:[%s4046_s7 + $0x1a0] ss:$28 sps:$4 sm:$0xff]  }
 0x1c4   :  { %2670 = vmatpush3.bf16.msra.mxu1 %v2879_v23  ;;  %v2960_v23 = vld [vmem:[%s4046_s7 + $0x1d4] ss:$28 sps:$4 sm:$0xff]  }
 0x1c5   :  { %2671 = vmatprep.subr.bf16.mxu1 %v3098_v61  ;;  %2206 = vmatpush1.bf16.msra.mxu0 %v2952_v22 }
 0x1c6   :  { %2207 = vmatprep.subr.bf16.mxu0 %v2960_v23 }
 0x1c8   :  { %2672 = vmatpush3.bf16.msra.mxu1 %v2880_v24  ;;  %v2958_v24 = vld [vmem:[%s4046_s7 + $0x1d0] ss:$28 sps:$4 sm:$0xff]  }
 0x1c9   :  { %2677 = vmatprep.subr.bf16.mxu1 %v3098_v61  ;;  %2208 = vmatpush1.bf16.msra.mxu0 %v2958_v24 }
 0x27e   :  { %v2617_v25 = vpop.f32.mrb[0].mxu1 }
 0x27f   :  { %v2618_v27 = vpop.f32.mrb[1].mxu1 }
 0x280   :  { %v2619_v28 = vadd.f32 %v2618_v27, %v2617_v25  ;;  %v2620_v29 = vpop.f32.mrb[2].mxu1  ;;  %v2966_v25 = vld [vmem:[%s4046_s7 + $0x20c] ss:$28 sps:$4 sm:$0xff]   ;;  %v2972_v27 = vld [vmem:[%s4046_s7 + $0x244] ss:$28 sps:$4 sm:$0xff]  }
 0x281   :  { %v2621_v30 = vpop.f32.mrb[3].mxu1  ;;  %2209 = vmatprep.subr.bf16.mxu0 %v2966_v25  ;;  %v2978_v29 = vld [vmem:[%s4046_s7 + $0x27c] ss:$28 sps:$4 sm:$0xff]  }
 0x282   :  { %v1009_v31 = vadd.f32 %v2619_v28, %v2436_v26  ;;  %v2964_v26 = vld [vmem:[%s4046_s7 + $0x208] ss:$28 sps:$4 sm:$0xff]   ;;  %v2970_v28 = vld [vmem:[%s4046_s7 + $0x240] ss:$28 sps:$4 sm:$0xff]   ;;  %v2976_v30 = vld [vmem:[%s4046_s7 + $0x278] ss:$28 sps:$4 sm:$0xff]  }
 0x283   :  { %2210 = vmatpush1.bf16.msra.mxu0 %v2964_v26 }
 0x284   :  { %vm1014_vm4 = vcmp.ge.f32.partialorder %v1009_v31, 0.0  ;;  %v1015_v32 = vmul.f32 0.1, %v1009_v31  ;;  %2211 = vmatprep.subr.bf16.mxu0 %v2972_v27 }
 0x286   :  { %v1016_v33 = vsel %vm1014_vm4, %v1009_v31, %v1015_v32  ;;  %v2984_v31 = vld [vmem:[%s4046_s7 + $0x2b4] ss:$28 sps:$4 sm:$0xff]  }
 0x287   :  { %v1018_v34 = vpack.c.bf16 %v1016_v33, %v1016_v33  ;;  %2212 = vmatpush1.bf16.msra.mxu0 %v2970_v28  ;;  %v2982_v32 = vld [vmem:[%s4046_s7 + $0x2b0] ss:$28 sps:$4 sm:$0xff]   ;;  %v2988_v33 = vld [vmem:[%s4046_s7 + $0x2e8] ss:$28 sps:$4 sm:$0xff]  }
 0x288   :  { %2213 = vmatprep.subr.bf16.mxu0 %v2978_v29 }
 0x289   :  { %2674 = vmatmul.mubr.bf16.vlgmr.msra.gmra.mrb[4].mxu1 %v1018_v34  ;;  %v2990_v34 = vld [vmem:[%s4046_s7 + $0x2ec] ss:$28 sps:$4 sm:$0xff]  }
 0x28a   :  { %2681 = vmatprep.mubr.msk.bf16.mxu1 %vm3099_vm3, %v3098_v61  ;;  %2678 = vmatpush3.bf16.msra.mxu1 %v2881_v40 }
 0x28b   :  { %2679 = vmatprep.subr.bf16.mxu1 %v3098_v61  ;;  %v2900_v61 = vld [vmem:[%s4044_s6 + $0x54] ss:$8 sps:$4 sm:$0xff]   ;;  %2214 = vmatpush1.bf16.msra.mxu0 %v2976_v30 }
 0x28c   :  { %2215 = vmatprep.subr.bf16.mxu0 %v2984_v31 }
 0x28e   :  { %2680 = vmatpush3.bf16.msra.mxu1 %v2882_v44 }
 0x28f   :  { %1319 = vmatprep.subr.bf16.mxu1 %v2885_v45  ;;  %2216 = vmatpush1.bf16.msra.mxu0 %v2982_v32  ;;  %v2915_v45 = vld [vmem:[%s4046_s7 + $0x3c] ss:$28 sps:$4 sm:$0xff]  }
 0x290   :  { %2217 = vmatprep.subr.bf16.mxu0 %v2990_v34 }
 0x293   :  { %2218 = vmatpush1.bf16.msra.mxu0 %v2988_v33  ;;  %v3003_v33 = vld [vmem:[%s4046_s7 + $0x8] ss:$28 sps:$4 sm:$0xff]  }
 0x294   :  { %2219 = vmatprep.subr.bf16.mxu0 %v2996_v12  ;;  %v3059_v12 = vld [vmem:[%s4046_s7 + $0x2b8] ss:$28 sps:$4 sm:$0xff]  }
 0x297   :  { %2220 = vmatpush1.bf16.msra.mxu0 %v2994_v13  ;;  %v3060_v13 = vld [vmem:[%s4046_s7 + $0xf8] ss:$28 sps:$4 sm:$0xff]  }
 0x298   :  { %2221 = vmatprep.subr.bf16.mxu0 %v3002_v16  ;;  %v3063_v16 = vld [vmem:[%s4046_s7 + $0x328] ss:$28 sps:$4 sm:$0xff]  }
 0x29b   :  { %2222 = vmatpush1.bf16.msra.mxu0 %v3000_v17  ;;  %v3064_v17 = vld [vmem:[%s4046_s7 + $0x168] ss:$28 sps:$4 sm:$0xff]  }
 0x35c   :  { %v1123_v36 = vpop.f32.mrb[4].mxu1 }
 0x35d   :  { %v1124_v37 = vadd.f32 %v2453_v35, %v1123_v36  ;;  %v2675_v38 = vpop.f32.mrb[5].mxu1  ;;  %v2462_v35 = vld [vmem:[%s4041_s8 + $0x4] ss:$0 sm:$0xff] }
 0x35e   :  { %v1126_v39 = vpop.f32.mrb[6].mxu1 }
 0x35f   :  { %v1129_v41 = vmul.f32 0.5, %v1124_v37  ;;  %2321 = vst [vmem:[%s4042_s10] sm:$0xff] %v1124_v37  ;;  %v2676_v42 = vpop.f32.mrb[7].mxu1 }
 0x361   :  { %v1130_v43 = vmul.f32 1.442695, %v1129_v41 }
 0x363   :  { %3067 = vpow2.f32 %v1130_v43  ;;  %v2907_v43 = vld [vmem:[%s4046_s7] ss:$28 sps:$4 sm:$0xff]  }
 0x36d   :  { %v3068_v46 = vpop.eup %3067 }
 0x36e   :  { %1134 = vrot.lane.b32.xlu0 %v3068_v46, %s3100_s12  ;;  %v2913_v46 = vld [vmem:[%s4046_s7 + $0x38] ss:$28 sps:$4 sm:$0xff]  }
 0x3e0   :  { %v1135_v48 = vpop.permute.xlu0 %1134 }
 0x3e1   :  { %v1137_v49 = vmul.f32 %v1135_v48, %v1132_v47  ;;  %v2921_v47 = vld [vmem:[%s4046_s7 + $0x74] ss:$28 sps:$4 sm:$0xff]  }
 0x3e2   :  { %v2919_v48 = vld [vmem:[%s4046_s7 + $0x70] ss:$28 sps:$4 sm:$0xff]  }
 0x3e3   :  { %v1138_v50 = vadd.f32 %v1137_v49, %v1124_v37  ;;  %v2927_v49 = vld [vmem:[%s4046_s7 + $0xac] ss:$28 sps:$4 sm:$0xff]  }
 0x3e5   :  { %v1140_v52 = vpack.c.bf16 %v1138_v50, %v1138_v50  ;;  %v2925_v50 = vld [vmem:[%s4046_s7 + $0xa8] ss:$28 sps:$4 sm:$0xff]  }
 0x3e7   :  { %2682 = vmatmul.mubr.msk.bf16.vlgmr.msra.gmra.mrb[8].mxu1 %vm1163_vm5, %v1140_v52  ;;  %v2931_v52 = vld [vmem:[%s4046_s7 + $0xe0] ss:$28 sps:$4 sm:$0xff]  }
 0x3e8   :  { %1320 = vmatpush1.bf16.msra.mxu1 %v2883_v51  ;;  %1351 = vmatprep.mubr.bf16.mxu1 %v3097_v55  ;;  %v2892_v55 = vld [vmem:[%s4044_s6 + $0x30] ss:$8 sps:$4 sm:$0xff]   ;;  %v2933_v51 = vld [vmem:[%s4046_s7 + $0xe4] ss:$28 sps:$4 sm:$0xff]  }
 0x3e9   :  { %1321 = vmatprep.subr.bf16.mxu1 %v2888_v53  ;;  %v2939_v53 = vld [vmem:[%s4046_s7 + $0x11c] ss:$28 sps:$4 sm:$0xff]  }
 0x3ec   :  { %1322 = vmatpush1.bf16.msra.mxu1 %v2886_v54  ;;  %v2937_v54 = vld [vmem:[%s4046_s7 + $0x118] ss:$28 sps:$4 sm:$0xff]  }
 0x3ed   :  { %1323 = vmatprep.subr.bf16.mxu1 %v2891_v56  ;;  %v2945_v56 = vld [vmem:[%s4046_s7 + $0x154] ss:$28 sps:$4 sm:$0xff]  }
 0x3f0   :  { %1324 = vmatpush1.bf16.msra.mxu1 %v2889_v57  ;;  %v2943_v57 = vld [vmem:[%s4046_s7 + $0x150] ss:$28 sps:$4 sm:$0xff]  }
 0x3f1   :  { %1325 = vmatprep.subr.bf16.mxu1 %v2894_v58  ;;  %v2951_v58 = vld [vmem:[%s4046_s7 + $0x18c] ss:$28 sps:$4 sm:$0xff]  }
 0x3f4   :  { %1326 = vmatpush1.bf16.msra.mxu1 %v2892_v55  ;;  %v2949_v55 = vld [vmem:[%s4046_s7 + $0x188] ss:$28 sps:$4 sm:$0xff]  }
 0x3f5   :  { %1327 = vmatprep.subr.bf16.mxu1 %v2897_v59  ;;  %v2957_v59 = vld [vmem:[%s4046_s7 + $0x1c4] ss:$28 sps:$4 sm:$0xff]  }
 0x3f8   :  { %1328 = vmatpush1.bf16.msra.mxu1 %v2895_v60  ;;  %v2955_v60 = vld [vmem:[%s4046_s7 + $0x1c0] ss:$28 sps:$4 sm:$0xff]  }
 0x3f9   :  { %1329 = vmatprep.subr.bf16.mxu1 %v2900_v61  ;;  %v2963_v61 = vld [vmem:[%s4046_s7 + $0x1fc] ss:$28 sps:$4 sm:$0xff]  }
 0x3fc   :  { %1330 = vmatpush1.bf16.msra.mxu1 %v2898_v62  ;;  %v2961_v62 = vld [vmem:[%s4046_s7 + $0x1f8] ss:$28 sps:$4 sm:$0xff]  }
 0x3fd   :  { %1331 = vmatprep.subr.bf16.mxu1 %v2903_v1  ;;  %v2969_v1 = vld [vmem:[%s4046_s7 + $0x234] ss:$28 sps:$4 sm:$0xff]  }
 0x400   :  { %1332 = vmatpush1.bf16.msra.mxu1 %v2901_v3  ;;  %v2967_v3 = vld [vmem:[%s4046_s7 + $0x230] ss:$28 sps:$4 sm:$0xff]  }
 0x401   :  { %1333 = vmatprep.subr.bf16.mxu1 %v2906_v4  ;;  %v2975_v4 = vld [vmem:[%s4046_s7 + $0x26c] ss:$28 sps:$4 sm:$0xff]  }
 0x404   :  { %1334 = vmatpush1.bf16.msra.mxu1 %v2904_v5  ;;  %v2973_v5 = vld [vmem:[%s4046_s7 + $0x268] ss:$28 sps:$4 sm:$0xff]  }
 0x405   :  { %2109 = vmatprep.subr.bf16.mxu1 %v2909_v6  ;;  %v2981_v6 = vld [vmem:[%s4046_s7 + $0x2a4] ss:$28 sps:$4 sm:$0xff]  }
 0x4ba   :  { %v1201_v36 = vpop.f32.mrb[8].mxu1 }
 0x4bb   :  { %v1202_v37 = vadd.f32 %v2462_v35, %v1201_v36  ;;  %v2683_v38 = vpop.f32.mrb[9].mxu1  ;;  %v3008_v35 = vld [vmem:[%s4046_s7 + $0x44] ss:$28 sps:$4 sm:$0xff]  }
 0x4bc   :  { %v1204_v39 = vpop.f32.mrb[10].mxu1  ;;  %v3006_v36 = vld [vmem:[%s4046_s7 + $0x40] ss:$28 sps:$4 sm:$0xff]   ;;  %v3009_v38 = vld [vmem:[%s4046_s7 + $0x78] ss:$28 sps:$4 sm:$0xff]  }
 0x4bd   :  { %vm1207_vm6 = vcmp.ge.f32.partialorder %v1202_v37, 0.0  ;;  %v1208_v40 = vmul.f32 0.1, %v1202_v37  ;;  %v2684_v41 = vpop.f32.mrb[11].mxu1  ;;  %v3014_v39 = vld [vmem:[%s4046_s7 + $0xb4] ss:$28 sps:$4 sm:$0xff]  }
 0x4be   :  { %v3017_v41 = vld [vmem:[%s4046_s7 + $0xec] ss:$28 sps:$4 sm:$0xff]  }
 0x4bf   :  { %v1209_v42 = vsel %vm1207_vm6, %v1202_v37, %v1208_v40  ;;  %v3011_v37 = vld [vmem:[%s4046_s7 + $0x7c] ss:$28 sps:$4 sm:$0xff]   ;;  %v3012_v40 = vld [vmem:[%s4046_s7 + $0xb0] ss:$28 sps:$4 sm:$0xff]  }
 0x4c0   :  { %v1211_v44 = vpack.c.bf16 %v1209_v42, %v1209_v42  ;;  %v3015_v42 = vld [vmem:[%s4046_s7 + $0xe8] ss:$28 sps:$4 sm:$0xff]  }
 0x4c2   :  { %1352 = vmatmul.mubr.bf16.vlgmr.msra.gmra.mrb[12].mxu1 %v1211_v44  ;;  %v3018_v44 = vld [vmem:[%s4046_s7 + $0x120] ss:$28 sps:$4 sm:$0xff]  }
 0x4c3   :  { %2110 = vmatpush1.bf16.msra.mxu1 %v2907_v43  ;;  %v3020_v43 = vld [vmem:[%s4046_s7 + $0x124] ss:$28 sps:$4 sm:$0xff]  }
 0x4c4   :  { %2111 = vmatprep.subr.bf16.mxu1 %v2915_v45  ;;  %v3023_v45 = vld [vmem:[%s4046_s7 + $0x15c] ss:$28 sps:$4 sm:$0xff]  }
 0x4c7   :  { %2112 = vmatpush1.bf16.msra.mxu1 %v2913_v46  ;;  %v3021_v46 = vld [vmem:[%s4046_s7 + $0x158] ss:$28 sps:$4 sm:$0xff]  }
 0x4c8   :  { %2113 = vmatprep.subr.bf16.mxu1 %v2921_v47  ;;  %v3026_v47 = vld [vmem:[%s4046_s7 + $0x194] ss:$28 sps:$4 sm:$0xff]  }
 0x4cb   :  { %2114 = vmatpush1.bf16.msra.mxu1 %v2919_v48  ;;  %v3024_v48 = vld [vmem:[%s4046_s7 + $0x190] ss:$28 sps:$4 sm:$0xff]  }
 0x4cc   :  { %2115 = vmatprep.subr.bf16.mxu1 %v2927_v49  ;;  %v3029_v49 = vld [vmem:[%s4046_s7 + $0x1cc] ss:$28 sps:$4 sm:$0xff]  }
 0x4cf   :  { %2116 = vmatpush1.bf16.msra.mxu1 %v2925_v50  ;;  %v3027_v50 = vld [vmem:[%s4046_s7 + $0x1c8] ss:$28 sps:$4 sm:$0xff]  }
 0x4d0   :  { %2117 = vmatprep.subr.bf16.mxu1 %v2933_v51  ;;  %v3032_v51 = vld [vmem:[%s4046_s7 + $0x204] ss:$28 sps:$4 sm:$0xff]  }
 0x4d3   :  { %2118 = vmatpush1.bf16.msra.mxu1 %v2931_v52  ;;  %v3030_v52 = vld [vmem:[%s4046_s7 + $0x200] ss:$28 sps:$4 sm:$0xff]  }
 0x4d4   :  { %2119 = vmatprep.subr.bf16.mxu1 %v2939_v53  ;;  %v3035_v53 = vld [vmem:[%s4046_s7 + $0x23c] ss:$28 sps:$4 sm:$0xff]  }
 0x4d7   :  { %2120 = vmatpush1.bf16.msra.mxu1 %v2937_v54  ;;  %v3033_v54 = vld [vmem:[%s4046_s7 + $0x238] ss:$28 sps:$4 sm:$0xff]  }
 0x4d8   :  { %2121 = vmatprep.subr.bf16.mxu1 %v2945_v56  ;;  %v3038_v56 = vld [vmem:[%s4046_s7 + $0x274] ss:$28 sps:$4 sm:$0xff]  }
 0x4db   :  { %2122 = vmatpush1.bf16.msra.mxu1 %v2943_v57  ;;  %v3036_v57 = vld [vmem:[%s4046_s7 + $0x270] ss:$28 sps:$4 sm:$0xff]  }
 0x4dc   :  { %2123 = vmatprep.subr.bf16.mxu1 %v2951_v58  ;;  %v3041_v58 = vld [vmem:[%s4046_s7 + $0x2ac] ss:$28 sps:$4 sm:$0xff]  }
 0x4df   :  { %2124 = vmatpush1.bf16.msra.mxu1 %v2949_v55  ;;  %v3039_v55 = vld [vmem:[%s4046_s7 + $0x2a8] ss:$28 sps:$4 sm:$0xff]  }
 0x4e0   :  { %2125 = vmatprep.subr.bf16.mxu1 %v2957_v59  ;;  %v3044_v59 = vld [vmem:[%s4046_s7 + $0x2e4] ss:$28 sps:$4 sm:$0xff]  }
 0x4e3   :  { %2126 = vmatpush1.bf16.msra.mxu1 %v2955_v60  ;;  %v3042_v60 = vld [vmem:[%s4046_s7 + $0x2e0] ss:$28 sps:$4 sm:$0xff]  }
 0x4e4   :  { %2127 = vmatprep.subr.bf16.mxu1 %v2963_v61  ;;  %v3047_v61 = vld [vmem:[%s4046_s7 + $0x31c] ss:$28 sps:$4 sm:$0xff]  }
 0x4e7   :  { %2128 = vmatpush1.bf16.msra.mxu1 %v2961_v62  ;;  %v3045_v62 = vld [vmem:[%s4046_s7 + $0x318] ss:$28 sps:$4 sm:$0xff]  }
 0x4e8   :  { %2129 = vmatprep.subr.bf16.mxu1 %v2969_v1  ;;  %v3050_v1 = vld [vmem:[%s4046_s7 + $0x354] ss:$28 sps:$4 sm:$0xff]  }
 0x4eb   :  { %2130 = vmatpush1.bf16.msra.mxu1 %v2967_v3  ;;  %v3048_v3 = vld [vmem:[%s4046_s7 + $0x350] ss:$28 sps:$4 sm:$0xff]  }
 0x4ec   :  { %2131 = vmatprep.subr.bf16.mxu1 %v2975_v4  ;;  %v3051_v4 = vld [vmem:[%s4046_s7 + $0x1d8] ss:$28 sps:$4 sm:$0xff]  }
 0x4ef   :  { %2132 = vmatpush1.bf16.msra.mxu1 %v2973_v5  ;;  %v3052_v5 = vld [vmem:[%s4046_s7 + $0x18] ss:$28 sps:$4 sm:$0xff]  }
 0x4f0   :  { %2133 = vmatprep.subr.bf16.mxu1 %v2981_v6  ;;  %v3053_v6 = vld [vmem:[%s4046_s7 + $0x210] ss:$28 sps:$4 sm:$0xff]  }
 0x4f3   :  { %2134 = vmatpush1.bf16.msra.mxu1 %v2979_v7  ;;  %v3054_v7 = vld [vmem:[%s4046_s7 + $0x50] ss:$28 sps:$4 sm:$0xff]  }
 0x4f4   :  { %2135 = vmatprep.subr.bf16.mxu1 %v2987_v8  ;;  %v3055_v8 = vld [vmem:[%s4046_s7 + $0x248] ss:$28 sps:$4 sm:$0xff]  }
 0x4f7   :  { %2136 = vmatpush1.bf16.msra.mxu1 %v2985_v9  ;;  %v3056_v9 = vld [vmem:[%s4046_s7 + $0x88] ss:$28 sps:$4 sm:$0xff]  }
 0x4f8   :  { %2137 = vmatprep.subr.bf16.mxu1 %v2993_v10  ;;  %v3057_v10 = vld [vmem:[%s4046_s7 + $0x280] ss:$28 sps:$4 sm:$0xff]  }
 0x4fb   :  { %2138 = vmatpush1.bf16.msra.mxu1 %v2991_v11  ;;  %v3058_v11 = vld [vmem:[%s4046_s7 + $0xc0] ss:$28 sps:$4 sm:$0xff]  }
 0x4fc   :  { %2139 = vmatprep.subr.bf16.mxu1 %v2999_v14  ;;  %v3061_v14 = vld [vmem:[%s4046_s7 + $0x2f0] ss:$28 sps:$4 sm:$0xff]  }
 0x4ff   :  { %2140 = vmatpush1.bf16.msra.mxu1 %v2997_v15  ;;  %v3062_v15 = vld [vmem:[%s4046_s7 + $0x130] ss:$28 sps:$4 sm:$0xff]  }
 0x500   :  { %2150 = vmatprep.subr.bf16.mxu1 %v3005_v18  ;;  %v3065_v18 = vld [vmem:[%s4046_s7 + $0x360] ss:$28 sps:$4 sm:$0xff]  }
 0x595   :  { %v1353_v22 = vpop.f32.mrb[12].mxu1 }
 0x596   :  { %v1354_v23 = vadd.f32 %v1353_v22, %v1232_v20  ;;  %v1355_v24 = vpop.f32.mrb[13].mxu1  ;;  %v1516_v20 = vsub.s32 4, %v3525_v63  ;;  %v1520_v22 = vsub.s32 5, %v3525_v63 }
 0x597   :  { %v1356_v25 = vadd.f32 %v1355_v24, %v1236_v21  ;;  %v1357_v26 = vpop.f32.mrb[14].mxu1  ;;  %v4000_v21 = vld [vmem:[%s4041_s8 + $0x7] sm:$0x7f] }
 0x598   :  { %vm1360_vm7 = vcmp.ge.f32.partialorder %v1354_v23, 0.0  ;;  %v1362_v27 = vmul.f32 0.1, %v1354_v23  ;;  %v1358_v28 = vpop.f32.mrb[15].mxu1  ;;  %v1517_v24 = vrot.slane %v4000_v21, %v1516_v20  ;;  %v1521_v26 = vrot.slane %v4000_v21, %v1520_v22 }
 0x599   :  { %vm1361_vm8 = vcmp.ge.f32.partialorder %v1356_v25, 0.0  ;;  %v1363_v29 = vmul.f32 0.1, %v1356_v25 }
 0x59a   :  { %v1364_v30 = vsel %vm1360_vm7, %v1354_v23, %v1362_v27  ;;  %v1501_v23 = vrot.slane %v4000_v21, %v3528_v0 }
 0x59b   :  { %v1365_v31 = vsel %vm1361_vm8, %v1356_v25, %v1363_v29  ;;  %v3848_v34 = vpack.c.bf16 %v1364_v30, %v1364_v30  ;;  %v1505_v25 = vrot.slane %v4000_v21, %v3534_v2 }
 0x59c   :  { %v3843_v32 = vpack.c.bf16 %v1365_v31, %v1365_v31 }
 0x59e   :  { %2141 = vmatprep.mubr.bf16.mxu1 %v3843_v32  ;;  %2223 = vmatprep.mubr.bf16.mxu0 %v3843_v32 }
 0x59f   :  { %2142 = vmatmul.mubr.bf16.vlgmr.msra.gmra.mrb[16].mxu1 %v3848_v34  ;;  %2224 = vmatmul.mubr.bf16.vlgmr.msra.gmra.mrb[4].mxu0 %v3848_v34 }
 0x5a0   :  { %2151 = vmatpush1.bf16.msra.mxu1 %v3003_v33  ;;  %2182 = vmatprep.mubr.bf16.mxu1 %v3843_v32 }
 0x5a1   :  { %2152 = vmatprep.subr.bf16.mxu1 %v3008_v35 }
 0x5a4   :  { %2153 = vmatpush1.bf16.msra.mxu1 %v3006_v36 }
 0x5a5   :  { %2154 = vmatprep.subr.bf16.mxu1 %v3011_v37 }
 0x5a8   :  { %2155 = vmatpush1.bf16.msra.mxu1 %v3009_v38 }
 0x5a9   :  { %2156 = vmatprep.subr.bf16.mxu1 %v3014_v39 }
 0x5ac   :  { %2157 = vmatpush1.bf16.msra.mxu1 %v3012_v40 }
 0x5ad   :  { %2158 = vmatprep.subr.bf16.mxu1 %v3017_v41 }
 0x5b0   :  { %2159 = vmatpush1.bf16.msra.mxu1 %v3015_v42 }
 0x5b1   :  { %2160 = vmatprep.subr.bf16.mxu1 %v3020_v43 }
 0x5b4   :  { %2161 = vmatpush1.bf16.msra.mxu1 %v3018_v44 }
 0x5b5   :  { %2162 = vmatprep.subr.bf16.mxu1 %v3023_v45 }
 0x5b8   :  { %2163 = vmatpush1.bf16.msra.mxu1 %v3021_v46 }
 0x5b9   :  { %2164 = vmatprep.subr.bf16.mxu1 %v3026_v47 }
 0x5bc   :  { %2165 = vmatpush1.bf16.msra.mxu1 %v3024_v48 }
 0x5bd   :  { %2166 = vmatprep.subr.bf16.mxu1 %v3029_v49 }
 0x5c0   :  { %2167 = vmatpush1.bf16.msra.mxu1 %v3027_v50 }
 0x5c1   :  { %2168 = vmatprep.subr.bf16.mxu1 %v3032_v51 }
 0x5c4   :  { %2169 = vmatpush1.bf16.msra.mxu1 %v3030_v52 }
 0x5c5   :  { %2170 = vmatprep.subr.bf16.mxu1 %v3035_v53  ;;  %v1508_v53 = vsub.s32 2, %v3525_v63 }
 0x5c8   :  { %2171 = vmatpush1.bf16.msra.mxu1 %v3033_v54  ;;  %v1512_v54 = vsub.s32 3, %v3525_v63 }
 0x5c9   :  { %2172 = vmatprep.subr.bf16.mxu1 %v3038_v56  ;;  %v1509_v56 = vrot.slane %v4000_v21, %v1508_v53 }
 0x5cc   :  { %2173 = vmatpush1.bf16.msra.mxu1 %v3036_v57  ;;  %v1513_v57 = vrot.slane %v4000_v21, %v1512_v54 }
 0x5cd   :  { %2174 = vmatprep.subr.bf16.mxu1 %v3041_v58 }
 0x5d0   :  { %2175 = vmatpush1.bf16.msra.mxu1 %v3039_v55 }
 0x5d1   :  { %2176 = vmatprep.subr.bf16.mxu1 %v3044_v59 }
 0x5d4   :  { %2177 = vmatpush1.bf16.msra.mxu1 %v3042_v60 }
 0x5d5   :  { %2178 = vmatprep.subr.bf16.mxu1 %v3047_v61 }
 0x5d8   :  { %2179 = vmatpush1.bf16.msra.mxu1 %v3045_v62 }
 0x5d9   :  { %2180 = vmatprep.subr.bf16.mxu1 %v3050_v1 }
 0x5dc   :  { %2181 = vmatpush1.bf16.msra.mxu1 %v3048_v3 }
 0x5dd   :  { %2635 = vmatprep.subr.bf16.mxu1 %v3051_v4 }
 0x5df   :  { %2183 = vmatmul.mubr.bf16.vlgmr.msra.gmra.mrb[20].mxu1 %v3848_v34 }
 0x5e0   :  { %2636 = vmatpush3.bf16.msra.mxu1 %v3052_v5  ;;  %2264 = vmatprep.mubr.bf16.mxu1 %v3843_v32 }
 0x5e1   :  { %2637 = vmatprep.subr.bf16.mxu1 %v3053_v6 }
 0x5e4   :  { %2638 = vmatpush3.bf16.msra.mxu1 %v3054_v7 }
 0x5e5   :  { %2639 = vmatprep.subr.bf16.mxu1 %v3055_v8 }
 0x5e8   :  { %2640 = vmatpush3.bf16.msra.mxu1 %v3056_v9  ;;  %v1524_v9 = vsub.s32 6, %v3525_v63 }
 0x5e9   :  { %2641 = vmatprep.subr.bf16.mxu1 %v3057_v10 }
 0x5ec   :  { %2642 = vmatpush3.bf16.msra.mxu1 %v3058_v11 }
 0x5ed   :  { %2643 = vmatprep.subr.bf16.mxu1 %v3059_v12  ;;  %v1525_v12 = vrot.slane %v4000_v21, %v1524_v9 }
 0x5f0   :  { %2644 = vmatpush3.bf16.msra.mxu1 %v3060_v13 }
 0x5f1   :  { %2645 = vmatprep.subr.bf16.mxu1 %v3061_v14 }
 0x5f4   :  { %2646 = vmatpush3.bf16.msra.mxu1 %v3062_v15 }
 0x5f5   :  { %2647 = vmatprep.subr.bf16.mxu1 %v3063_v16 }
 0x5f8   :  { %2648 = vmatpush3.bf16.msra.mxu1 %v3064_v17 }
 0x5f9   :  { %2649 = vmatprep.subr.bf16.mxu1 %v3065_v18 }
 0x5fc   :  { %2650 = vmatpush3.bf16.msra.mxu1 %v3066_v19 }
 0x5ff   :  { %2265 = vmatmul.mubr.bf16.vlgmr.msra.gmra.mrb[24].mxu1 %v3848_v34 }
 0x672   :  { %v2143_v27 = vpop.f32.mrb[16].mxu1  ;;  %v2225_v28 = vpop.f32.mrb[4].mxu0 }
 0x673   :  { %v2144_v29 = vadd.f32 %v2143_v27, %v1501_v23  ;;  %v2226_v30 = vadd.f32 %v2225_v28, %v1517_v24  ;;  %v2145_v31 = vpop.f32.mrb[17].mxu1  ;;  %v2227_v32 = vpop.f32.mrb[5].mxu0 }
 0x674   :  { %v2146_v33 = vadd.f32 %v2145_v31, %v1505_v25  ;;  %v2228_v34 = vadd.f32 %v2227_v32, %v1521_v26  ;;  %v2147_v35 = vpop.f32.mrb[18].mxu1  ;;  %v2229_v36 = vpop.f32.mrb[6].mxu0 }
 0x675   :  { %v2594_v37 = vmul.f32 -1.442695, %v2144_v29  ;;  %v2598_v38 = vmul.f32 -1.442695, %v2226_v30  ;;  %v2148_v0 = vpop.f32.mrb[19].mxu1  ;;  %v2230_v39 = vpop.f32.mrb[7].mxu0 }
 0x676   :  { %v2595_v40 = vmul.f32 -1.442695, %v2146_v33  ;;  %v2599_v41 = vmul.f32 -1.442695, %v2228_v34 }
 0x677   :  { %3069 = vpow2.f32 %v2594_v37 }
 0x678   :  { %3071 = vpow2.f32 %v2598_v38 }
 0x679   :  { %3073 = vpow2.f32 %v2595_v40 }
 0x67a   :  { %3075 = vpow2.f32 %v2599_v41 }
 0x681   :  { %v3070_v2 = vpop.eup %3069 }
 0x682   :  { %v3072_v42 = vpop.eup %3071  ;;  %v2293_v43 = vadd.f32 1.0, %v3070_v2 }
 0x683   :  { %v3074_v44 = vpop.eup %3073  ;;  %v2297_v45 = vadd.f32 1.0, %v3072_v42 }
 0x684   :  { %v3076_v46 = vpop.eup %3075  ;;  %3077 = vrcp.f32 %v2293_v43  ;;  %v2294_v47 = vadd.f32 1.0, %v3074_v44 }
 0x685   :  { %3079 = vrcp.f32 %v2297_v45  ;;  %v2298_v48 = vadd.f32 1.0, %v3076_v46 }
 0x686   :  { %3081 = vrcp.f32 %v2294_v47 }
 0x687   :  { %3083 = vrcp.f32 %v2298_v48 }
 0x68e   :  { %v3078_v49 = vpop.eup %3077 }
 0x68f   :  { %v3080_v50 = vpop.eup %3079  ;;  %2314 = vst [vmem:[%s4047_s9] sm:$0xff] %v3078_v49 }
 0x690   :  { %v3082_v51 = vpop.eup %3081  ;;  %2318 = vst [vmem:[%s4047_s9 + $0x20] sm:$0xff] %v3080_v50 }
 0x691   :  { %v3084_v52 = vpop.eup %3083  ;;  %2315 = vst [vmem:[%s4047_s9 + $0x8] sm:$0xff] %v3082_v51 }
 0x692   :  { %2319 = vst [vmem:[%s4047_s9 + $0x28] sm:$0xff] %v3084_v52 }
 0x6b2   :  { %v2184_v58 = vpop.f32.mrb[20].mxu1 }
 0x6b3   :  { %v2185_v55 = vadd.f32 %v2184_v58, %v1509_v56  ;;  %v2186_v59 = vpop.f32.mrb[21].mxu1 }
 0x6b4   :  { %v2187_v60 = vadd.f32 %v2186_v59, %v1513_v57  ;;  %v2188_v61 = vpop.f32.mrb[22].mxu1 }
 0x6b5   :  { %v2596_v62 = vmul.f32 -1.442695, %v2185_v55  ;;  %v2189_v1 = vpop.f32.mrb[23].mxu1 }
 0x6b6   :  { %v2597_v3 = vmul.f32 -1.442695, %v2187_v60 }
 0x6b7   :  { %3085 = vpow2.f32 %v2596_v62 }
 0x6b8   :  { %3087 = vpow2.f32 %v2597_v3 }
 0x6c1   :  { %v3086_v4 = vpop.eup %3085 }
 0x6c2   :  { %v3088_v5 = vpop.eup %3087  ;;  %v2295_v6 = vadd.f32 1.0, %v3086_v4 }
 0x6c3   :  { %v2296_v7 = vadd.f32 1.0, %v3088_v5 }
 0x6c4   :  { %3089 = vrcp.f32 %v2295_v6 }
 0x6c5   :  { %3091 = vrcp.f32 %v2296_v7 }
 0x6ce   :  { %v3090_v8 = vpop.eup %3089 }
 0x6cf   :  { %v3092_v10 = vpop.eup %3091  ;;  %2316 = vst [vmem:[%s4047_s9 + $0x10] sm:$0xff] %v3090_v8 }
 0x6d0   :  { %2317 = vst [vmem:[%s4047_s9 + $0x18] sm:$0xff] %v3092_v10 }
 0x6d2   :  { %v2651_v11 = vpop.f32.mrb[24].mxu1 }
 0x6d3   :  { %v2652_v13 = vpop.f32.mrb[25].mxu1 }
 0x6d4   :  { %v2653_v14 = vadd.f32 %v2652_v13, %v2651_v11  ;;  %v2654_v15 = vpop.f32.mrb[26].mxu1 }
 0x6d5   :  { %v2655_v16 = vpop.f32.mrb[27].mxu1 }
 0x6d6   :  { %v2267_v17 = vadd.f32 %v2653_v14, %v1525_v12 }
 0x6d8   :  { %v2600_v18 = vmul.f32 -1.442695, %v2267_v17 }
 0x6da   :  { %3093 = vpow2.f32 %v2600_v18 }
 0x6e4   :  { %v3094_v63 = vpop.eup %3093 }
 0x6e5   :  { %v2299_v19 = vadd.f32 1.0, %v3094_v63 }
 0x6e7   :  { %3095 = vrcp.f32 %v2299_v19 }
 0x6f1   :  { %v3096_v20 = vpop.eup %3095 }
 0x6f2   :  { %2320 = vst.msk [vmem:[%s4047_s9 + $0x30] sm:$0xff] %vm663_vm0, %v3096_v20 }

</bundles_post_ra>
